<compile_context>
chip_gen: v7x
topology: tpu7x:2x2x1
jax: 0.10.0
libtpu: 0.0.40
codegen_flags: <defaults>
</compile_context>

<pallas_src>
import functools

import jax
import jax.numpy as jnp
from jax.experimental import pallas as pl
from jax.experimental.pallas import tpu as pltpu


def _critic_kernel(x_ref, w1_ref, b1_ref, w2_ref, b2_ref, w3_ref, b3_ref,
                   w4_ref, b4_ref, out_ref, s1_all_ref, s2_all_ref,
                   *, T, tau, v_threshold, v_reset):
    x = x_ref[...]
    B = x.shape[0]
    H = w1_ref.shape[1]

    # Trace-time constants for the folded (closed-form) LIF update.
    inv_tau = 1.0 / tau
    keep = 1.0 - inv_tau
    # mem_T = sum_t c_t * (h4_t + v_reset), with c_t = keep^(T-1-t) * inv_tau.
    coeffs = [(keep ** (T - 1 - t)) * inv_tau for t in range(T)]
    coeff_sum = float(sum(coeffs))

    # -------- Layer 1: Linear once (input constant over time) + T-step IF --------
    h1 = jnp.dot(x, w1_ref[...], preferred_element_type=jnp.float32) + b1_ref[...]
    v1 = jnp.zeros((B, H), jnp.float32)
    for t in range(T):                       # VPU-only recurrence, T=16 unrolled
        v1 = v1 + h1
        spk1 = v1 >= v_threshold             # bool mask computed once, reused
        s1_all_ref[t * B:(t + 1) * B, :] = spk1.astype(jnp.float32)
        v1 = jnp.where(spk1, v_reset, v1)    # hard reset

    # -------- Layer 2: ONE batched (T*B,H)@(H,H) MXU dot, bias added once --------
    h2_all = jnp.dot(s1_all_ref[...], w2_ref[...],
                     preferred_element_type=jnp.float32) + b2_ref[...]
    v2 = jnp.zeros((B, H), jnp.float32)
    for t in range(T):
        v2 = v2 + h2_all[t * B:(t + 1) * B, :]
        spk2 = v2 >= v_threshold
        s2_all_ref[t * B:(t + 1) * B, :] = spk2.astype(jnp.float32)
        v2 = jnp.where(spk2, v_reset, v2)

    # -------- Layer 3: ONE batched MXU dot, then IF + weighted spike reduction ----
    h3_all = jnp.dot(s2_all_ref[...], w3_ref[...],
                     preferred_element_type=jnp.float32) + b3_ref[...]
    v3 = jnp.zeros((B, H), jnp.float32)
    s3_weighted = jnp.zeros((B, H), jnp.float32)
    for t in range(T):
        v3 = v3 + h3_all[t * B:(t + 1) * B, :]
        spk3 = v3 >= v_threshold
        # Apply the closed-form LIF weight before the final matmul (coeffs are
        # exact powers of two for tau=2, so this reweighting is exact in f32).
        s3_weighted = s3_weighted + coeffs[t] * spk3.astype(jnp.float32)
        v3 = jnp.where(spk3, v_reset, v3)

    # -------- Output layer: single small dot + scaled bias (no mem recurrence) ----
    mem = jnp.dot(s3_weighted, w4_ref[...], preferred_element_type=jnp.float32)
    bias = coeff_sum * b4_ref[...]
    if v_reset != 0.0:                        # drop dead add at trace time
        bias = bias + coeff_sum * v_reset
    out_ref[...] = (mem + bias).astype(out_ref.dtype)


def critic_forward(x, params, *, T=16, tau=2.0, v_threshold=1.0, v_reset=0.0):
    (w1, b1), (w2, b2), (w3, b3), (w4, b4) = params
    B = x.shape[0]
    H = w1.shape[1]
    A = w4.shape[1]
    kernel = functools.partial(_critic_kernel, T=T, tau=tau,
                               v_threshold=v_threshold, v_reset=v_reset)
    # Single grid point: every operand + the two (T*B, H) spike scratches fit in
    # VMEM as full blocks (~50 KB total). No tiling/grid — extra grid steps would
    # only add pipeline overhead to this tiny latency-bound kernel.
    return pl.pallas_call(
        kernel,
        out_shape=jax.ShapeDtypeStruct((B, A), jnp.float32),
        in_specs=[pl.BlockSpec(memory_space=pltpu.VMEM)] * 9,
        out_specs=pl.BlockSpec(memory_space=pltpu.VMEM),
        scratch_shapes=[pltpu.VMEM((T * B, H), jnp.float32),
                        pltpu.VMEM((T * B, H), jnp.float32)],
    )(x, w1, b1, w2, b2, w3, b3, w4, b4)


def _init_linear(key, fan_in, fan_out):
    # Deterministic, PyTorch-nn.Linear-style uniform(-1/sqrt(fan_in), 1/sqrt(fan_in)).
    kw, kb = jax.random.split(key)
    bound = 1.0 / jnp.sqrt(jnp.float32(fan_in))
    w = jax.random.uniform(kw, (fan_in, fan_out), jnp.float32, -bound, bound)
    b = jax.random.uniform(kb, (1, fan_out), jnp.float32, -bound, bound)
    return w, b


def _reference(x, params, *, T=16, tau=2.0, v_th=1.0, v_reset=0.0):
    # Direct transcription of the PyTorch module semantics (un-optimized form).
    (w1, b1), (w2, b2), (w3, b3), (w4, b4) = params
    B = x.shape[0]
    v1 = jnp.zeros((B, w1.shape[1]))
    v2 = jnp.zeros((B, w2.shape[1]))
    v3 = jnp.zeros((B, w3.shape[1]))
    mem = jnp.zeros((B, w4.shape[1]))
    for _ in range(T):
        v1 = v1 + (x @ w1 + b1)
        s1 = (v1 >= v_th).astype(jnp.float32)
        v1 = jnp.where(s1 > 0, v_reset, v1)
        v2 = v2 + (s1 @ w2 + b2)
        s2 = (v2 >= v_th).astype(jnp.float32)
        v2 = jnp.where(s2 > 0, v_reset, v2)
        v3 = v3 + (s2 @ w3 + b3)
        s3 = (v3 >= v_th).astype(jnp.float32)
        v3 = jnp.where(s3 > 0, v_reset, v3)
        h4 = s3 @ w4 + b4
        mem = mem + (h4 - (mem - v_reset)) / tau
    return mem


if __name__ == "__main__":
    # Small shapes consistent with the module: input_shape=32, ppo_hidden_size=32,
    # n_actions=4, batch=8, T=16.
    B, D_IN, H, A, T = 8, 32, 32, 4, 16

    key = jax.random.PRNGKey(0)
    kx, k1, k2, k3, k4 = jax.random.split(key, 5)

    x = jax.random.normal(kx, (B, D_IN), jnp.float32)
    params = (
        _init_linear(k1, D_IN, H),
        _init_linear(k2, H, H),
        _init_linear(k3, H, H),
        _init_linear(k4, H, A),
    )

    out = critic_forward(x, params, T=T)
    out = jax.block_until_ready(out)

    ref = _reference(x, params, T=T)
    assert out.shape == (B, A)
    assert jnp.allclose(out, ref, atol=1e-5, rtol=1e-5), "mismatch vs reference"

    print("KERNEL_OK")
</pallas_src>

<mosaic_0001>
module attributes {stable_mosaic.version = 11 : i64} {
  func.func @_critic_kernel(%arg0: memref<8x32xf32, #tpu.memory_space<vmem>>, %arg1: memref<32x32xf32, #tpu.memory_space<vmem>>, %arg2: memref<1x32xf32, #tpu.memory_space<vmem>>, %arg3: memref<32x32xf32, #tpu.memory_space<vmem>>, %arg4: memref<1x32xf32, #tpu.memory_space<vmem>>, %arg5: memref<32x32xf32, #tpu.memory_space<vmem>>, %arg6: memref<1x32xf32, #tpu.memory_space<vmem>>, %arg7: memref<32x4xf32, #tpu.memory_space<vmem>>, %arg8: memref<1x4xf32, #tpu.memory_space<vmem>>, %arg9: memref<8x4xf32, #tpu.memory_space<vmem>>, %arg10: memref<128x32xf32, #tpu.memory_space<vmem>>, %arg11: memref<128x32xf32, #tpu.memory_space<vmem>>) attributes {dimension_semantics = [], scalar_prefetch = 0 : i64, scratch_operands = 2 : i64, tpu.core_type = #tpu.core_type<tc>} {
    %c0 = arith.constant 0 : index
    %c0_0 = arith.constant 0 : index
    %0 = vector.load %arg0[%c0, %c0_0] : memref<8x32xf32, #tpu.memory_space<vmem>>, vector<8x32xf32>
    %c0_1 = arith.constant 0 : index
    %c0_2 = arith.constant 0 : index
    %1 = vector.load %arg1[%c0_1, %c0_2] : memref<32x32xf32, #tpu.memory_space<vmem>>, vector<32x32xf32>
    %cst = arith.constant dense<0.000000e+00> : vector<8x32xf32>
    %2 = tpu.matmul %0, %1, %cst {dimension_numbers = #tpu.dot_dimension_numbers<[1], [0], [0], [1], [0, 0, 1, 1], [], []>} : vector<8x32xf32>, vector<32x32xf32>, vector<8x32xf32> -> vector<8x32xf32>
    %c0_3 = arith.constant 0 : index
    %c0_4 = arith.constant 0 : index
    %3 = vector.load %arg2[%c0_3, %c0_4] : memref<1x32xf32, #tpu.memory_space<vmem>>, vector<1x32xf32>
    %4 = vector.broadcast %3 : vector<1x32xf32> to vector<8x32xf32>
    %5 = arith.addf %2, %4 : vector<8x32xf32>
    %cst_5 = arith.constant 0.000000e+00 : f32
    %6 = vector.broadcast %cst_5 : f32 to vector<8x32xf32>
    %7 = arith.addf %6, %5 : vector<8x32xf32>
    %cst_6 = arith.constant 1.000000e+00 : f32
    %8 = vector.broadcast %cst_6 : f32 to vector<8x32xf32>
    %9 = arith.cmpf oge, %7, %8 : vector<8x32xf32>
    %10 = arith.extui %9 : vector<8x32xi1> to vector<8x32xi32>
    %11 = arith.sitofp %10 : vector<8x32xi32> to vector<8x32xf32>
    %c0_7 = arith.constant 0 : index
    %c0_8 = arith.constant 0 : index
    %12 = vector.load %arg10[%c0_7, %c0_8] : memref<128x32xf32, #tpu.memory_space<vmem>>, vector<8x32xf32>
    tpu.vector_store %arg10[%c0_7, %c0_8], %11 {strides = array<i32>} : memref<128x32xf32, #tpu.memory_space<vmem>>, vector<8x32xf32>,
    %cst_9 = arith.constant 0.000000e+00 : f32
    %13 = vector.broadcast %cst_9 : f32 to vector<8x32xf32>
    %14 = arith.select %9, %13, %7 : vector<8x32xi1>, vector<8x32xf32>
    %15 = arith.addf %14, %5 : vector<8x32xf32>
    %cst_10 = arith.constant 1.000000e+00 : f32
    %16 = vector.broadcast %cst_10 : f32 to vector<8x32xf32>
    %17 = arith.cmpf oge, %15, %16 : vector<8x32xf32>
    %18 = arith.extui %17 : vector<8x32xi1> to vector<8x32xi32>
    %19 = arith.sitofp %18 : vector<8x32xi32> to vector<8x32xf32>
    %c8 = arith.constant 8 : index
    %c0_11 = arith.constant 0 : index
    %20 = vector.load %arg10[%c8, %c0_11] : memref<128x32xf32, #tpu.memory_space<vmem>>, vector<8x32xf32>
    tpu.vector_store %arg10[%c8, %c0_11], %19 {strides = array<i32>} : memref<128x32xf32, #tpu.memory_space<vmem>>, vector<8x32xf32>,
    %cst_12 = arith.constant 0.000000e+00 : f32
    %21 = vector.broadcast %cst_12 : f32 to vector<8x32xf32>
    %22 = arith.select %17, %21, %15 : vector<8x32xi1>, vector<8x32xf32>
    %23 = arith.addf %22, %5 : vector<8x32xf32>
    %cst_13 = arith.constant 1.000000e+00 : f32
    %24 = vector.broadcast %cst_13 : f32 to vector<8x32xf32>
    %25 = arith.cmpf oge, %23, %24 : vector<8x32xf32>
    %26 = arith.extui %25 : vector<8x32xi1> to vector<8x32xi32>
    %27 = arith.sitofp %26 : vector<8x32xi32> to vector<8x32xf32>
    %c16 = arith.constant 16 : index
    %c0_14 = arith.constant 0 : index
    %28 = vector.load %arg10[%c16, %c0_14] : memref<128x32xf32, #tpu.memory_space<vmem>>, vector<8x32xf32>
    tpu.vector_store %arg10[%c16, %c0_14], %27 {strides = array<i32>} : memref<128x32xf32, #tpu.memory_space<vmem>>, vector<8x32xf32>,
    %cst_15 = arith.constant 0.000000e+00 : f32
    %29 = vector.broadcast %cst_15 : f32 to vector<8x32xf32>
    %30 = arith.select %25, %29, %23 : vector<8x32xi1>, vector<8x32xf32>
    %31 = arith.addf %30, %5 : vector<8x32xf32>
    %cst_16 = arith.constant 1.000000e+00 : f32
    %32 = vector.broadcast %cst_16 : f32 to vector<8x32xf32>
    %33 = arith.cmpf oge, %31, %32 : vector<8x32xf32>
    %34 = arith.extui %33 : vector<8x32xi1> to vector<8x32xi32>
    %35 = arith.sitofp %34 : vector<8x32xi32> to vector<8x32xf32>
    %c24 = arith.constant 24 : index
    %c0_17 = arith.constant 0 : index
    %36 = vector.load %arg10[%c24, %c0_17] : memref<128x32xf32, #tpu.memory_space<vmem>>, vector<8x32xf32>
    tpu.vector_store %arg10[%c24, %c0_17], %35 {strides = array<i32>} : memref<128x32xf32, #tpu.memory_space<vmem>>, vector<8x32xf32>,
    %cst_18 = arith.constant 0.000000e+00 : f32
    %37 = vector.broadcast %cst_18 : f32 to vector<8x32xf32>
    %38 = arith.select %33, %37, %31 : vector<8x32xi1>, vector<8x32xf32>
    %39 = arith.addf %38, %5 : vector<8x32xf32>
    %cst_19 = arith.constant 1.000000e+00 : f32
    %40 = vector.broadcast %cst_19 : f32 to vector<8x32xf32>
    %41 = arith.cmpf oge, %39, %40 : vector<8x32xf32>
    %42 = arith.extui %41 : vector<8x32xi1> to vector<8x32xi32>
    %43 = arith.sitofp %42 : vector<8x32xi32> to vector<8x32xf32>
    %c32 = arith.constant 32 : index
    %c0_20 = arith.constant 0 : index
    %44 = vector.load %arg10[%c32, %c0_20] : memref<128x32xf32, #tpu.memory_space<vmem>>, vector<8x32xf32>
    tpu.vector_store %arg10[%c32, %c0_20], %43 {strides = array<i32>} : memref<128x32xf32, #tpu.memory_space<vmem>>, vector<8x32xf32>,
    %cst_21 = arith.constant 0.000000e+00 : f32
    %45 = vector.broadcast %cst_21 : f32 to vector<8x32xf32>
    %46 = arith.select %41, %45, %39 : vector<8x32xi1>, vector<8x32xf32>
    %47 = arith.addf %46, %5 : vector<8x32xf32>
    %cst_22 = arith.constant 1.000000e+00 : f32
    %48 = vector.broadcast %cst_22 : f32 to vector<8x32xf32>
    %49 = arith.cmpf oge, %47, %48 : vector<8x32xf32>
    %50 = arith.extui %49 : vector<8x32xi1> to vector<8x32xi32>
    %51 = arith.sitofp %50 : vector<8x32xi32> to vector<8x32xf32>
    %c40 = arith.constant 40 : index
    %c0_23 = arith.constant 0 : index
    %52 = vector.load %arg10[%c40, %c0_23] : memref<128x32xf32, #tpu.memory_space<vmem>>, vector<8x32xf32>
    tpu.vector_store %arg10[%c40, %c0_23], %51 {strides = array<i32>} : memref<128x32xf32, #tpu.memory_space<vmem>>, vector<8x32xf32>,
    %cst_24 = arith.constant 0.000000e+00 : f32
    %53 = vector.broadcast %cst_24 : f32 to vector<8x32xf32>
    %54 = arith.select %49, %53, %47 : vector<8x32xi1>, vector<8x32xf32>
    %55 = arith.addf %54, %5 : vector<8x32xf32>
    %cst_25 = arith.constant 1.000000e+00 : f32
    %56 = vector.broadcast %cst_25 : f32 to vector<8x32xf32>
    %57 = arith.cmpf oge, %55, %56 : vector<8x32xf32>
    %58 = arith.extui %57 : vector<8x32xi1> to vector<8x32xi32>
    %59 = arith.sitofp %58 : vector<8x32xi32> to vector<8x32xf32>
    %c48 = arith.constant 48 : index
    %c0_26 = arith.constant 0 : index
    %60 = vector.load %arg10[%c48, %c0_26] : memref<128x32xf32, #tpu.memory_space<vmem>>, vector<8x32xf32>
    tpu.vector_store %arg10[%c48, %c0_26], %59 {strides = array<i32>} : memref<128x32xf32, #tpu.memory_space<vmem>>, vector<8x32xf32>,
    %cst_27 = arith.constant 0.000000e+00 : f32
    %61 = vector.broadcast %cst_27 : f32 to vector<8x32xf32>
    %62 = arith.select %57, %61, %55 : vector<8x32xi1>, vector<8x32xf32>
    %63 = arith.addf %62, %5 : vector<8x32xf32>
    %cst_28 = arith.constant 1.000000e+00 : f32
    %64 = vector.broadcast %cst_28 : f32 to vector<8x32xf32>
    %65 = arith.cmpf oge, %63, %64 : vector<8x32xf32>
    %66 = arith.extui %65 : vector<8x32xi1> to vector<8x32xi32>
    %67 = arith.sitofp %66 : vector<8x32xi32> to vector<8x32xf32>
    %c56 = arith.constant 56 : index
    %c0_29 = arith.constant 0 : index
    %68 = vector.load %arg10[%c56, %c0_29] : memref<128x32xf32, #tpu.memory_space<vmem>>, vector<8x32xf32>
    tpu.vector_store %arg10[%c56, %c0_29], %67 {strides = array<i32>} : memref<128x32xf32, #tpu.memory_space<vmem>>, vector<8x32xf32>,
    %cst_30 = arith.constant 0.000000e+00 : f32
    %69 = vector.broadcast %cst_30 : f32 to vector<8x32xf32>
    %70 = arith.select %65, %69, %63 : vector<8x32xi1>, vector<8x32xf32>
    %71 = arith.addf %70, %5 : vector<8x32xf32>
    %cst_31 = arith.constant 1.000000e+00 : f32
    %72 = vector.broadcast %cst_31 : f32 to vector<8x32xf32>
    %73 = arith.cmpf oge, %71, %72 : vector<8x32xf32>
    %74 = arith.extui %73 : vector<8x32xi1> to vector<8x32xi32>
    %75 = arith.sitofp %74 : vector<8x32xi32> to vector<8x32xf32>
    %c64 = arith.constant 64 : index
    %c0_32 = arith.constant 0 : index
    %76 = vector.load %arg10[%c64, %c0_32] : memref<128x32xf32, #tpu.memory_space<vmem>>, vector<8x32xf32>
    tpu.vector_store %arg10[%c64, %c0_32], %75 {strides = array<i32>} : memref<128x32xf32, #tpu.memory_space<vmem>>, vector<8x32xf32>,
    %cst_33 = arith.constant 0.000000e+00 : f32
    %77 = vector.broadcast %cst_33 : f32 to vector<8x32xf32>
    %78 = arith.select %73, %77, %71 : vector<8x32xi1>, vector<8x32xf32>
    %79 = arith.addf %78, %5 : vector<8x32xf32>
    %cst_34 = arith.constant 1.000000e+00 : f32
    %80 = vector.broadcast %cst_34 : f32 to vector<8x32xf32>
    %81 = arith.cmpf oge, %79, %80 : vector<8x32xf32>
    %82 = arith.extui %81 : vector<8x32xi1> to vector<8x32xi32>
    %83 = arith.sitofp %82 : vector<8x32xi32> to vector<8x32xf32>
    %c72 = arith.constant 72 : index
    %c0_35 = arith.constant 0 : index
    %84 = vector.load %arg10[%c72, %c0_35] : memref<128x32xf32, #tpu.memory_space<vmem>>, vector<8x32xf32>
    tpu.vector_store %arg10[%c72, %c0_35], %83 {strides = array<i32>} : memref<128x32xf32, #tpu.memory_space<vmem>>, vector<8x32xf32>,
    %cst_36 = arith.constant 0.000000e+00 : f32
    %85 = vector.broadcast %cst_36 : f32 to vector<8x32xf32>
    %86 = arith.select %81, %85, %79 : vector<8x32xi1>, vector<8x32xf32>
    %87 = arith.addf %86, %5 : vector<8x32xf32>
    %cst_37 = arith.constant 1.000000e+00 : f32
    %88 = vector.broadcast %cst_37 : f32 to vector<8x32xf32>
    %89 = arith.cmpf oge, %87, %88 : vector<8x32xf32>
    %90 = arith.extui %89 : vector<8x32xi1> to vector<8x32xi32>
    %91 = arith.sitofp %90 : vector<8x32xi32> to vector<8x32xf32>
    %c80 = arith.constant 80 : index
    %c0_38 = arith.constant 0 : index
    %92 = vector.load %arg10[%c80, %c0_38] : memref<128x32xf32, #tpu.memory_space<vmem>>, vector<8x32xf32>
    tpu.vector_store %arg10[%c80, %c0_38], %91 {strides = array<i32>} : memref<128x32xf32, #tpu.memory_space<vmem>>, vector<8x32xf32>,
    %cst_39 = arith.constant 0.000000e+00 : f32
    %93 = vector.broadcast %cst_39 : f32 to vector<8x32xf32>
    %94 = arith.select %89, %93, %87 : vector<8x32xi1>, vector<8x32xf32>
    %95 = arith.addf %94, %5 : vector<8x32xf32>
    %cst_40 = arith.constant 1.000000e+00 : f32
    %96 = vector.broadcast %cst_40 : f32 to vector<8x32xf32>
    %97 = arith.cmpf oge, %95, %96 : vector<8x32xf32>
    %98 = arith.extui %97 : vector<8x32xi1> to vector<8x32xi32>
    %99 = arith.sitofp %98 : vector<8x32xi32> to vector<8x32xf32>
    %c88 = arith.constant 88 : index
    %c0_41 = arith.constant 0 : index
    %100 = vector.load %arg10[%c88, %c0_41] : memref<128x32xf32, #tpu.memory_space<vmem>>, vector<8x32xf32>
    tpu.vector_store %arg10[%c88, %c0_41], %99 {strides = array<i32>} : memref<128x32xf32, #tpu.memory_space<vmem>>, vector<8x32xf32>,
    %cst_42 = arith.constant 0.000000e+00 : f32
    %101 = vector.broadcast %cst_42 : f32 to vector<8x32xf32>
    %102 = arith.select %97, %101, %95 : vector<8x32xi1>, vector<8x32xf32>
    %103 = arith.addf %102, %5 : vector<8x32xf32>
    %cst_43 = arith.constant 1.000000e+00 : f32
    %104 = vector.broadcast %cst_43 : f32 to vector<8x32xf32>
    %105 = arith.cmpf oge, %103, %104 : vector<8x32xf32>
    %106 = arith.extui %105 : vector<8x32xi1> to vector<8x32xi32>
    %107 = arith.sitofp %106 : vector<8x32xi32> to vector<8x32xf32>
    %c96 = arith.constant 96 : index
    %c0_44 = arith.constant 0 : index
    %108 = vector.load %arg10[%c96, %c0_44] : memref<128x32xf32, #tpu.memory_space<vmem>>, vector<8x32xf32>
    tpu.vector_store %arg10[%c96, %c0_44], %107 {strides = array<i32>} : memref<128x32xf32, #tpu.memory_space<vmem>>, vector<8x32xf32>,
    %cst_45 = arith.constant 0.000000e+00 : f32
    %109 = vector.broadcast %cst_45 : f32 to vector<8x32xf32>
    %110 = arith.select %105, %109, %103 : vector<8x32xi1>, vector<8x32xf32>
    %111 = arith.addf %110, %5 : vector<8x32xf32>
    %cst_46 = arith.constant 1.000000e+00 : f32
    %112 = vector.broadcast %cst_46 : f32 to vector<8x32xf32>
    %113 = arith.cmpf oge, %111, %112 : vector<8x32xf32>
    %114 = arith.extui %113 : vector<8x32xi1> to vector<8x32xi32>
    %115 = arith.sitofp %114 : vector<8x32xi32> to vector<8x32xf32>
    %c104 = arith.constant 104 : index
    %c0_47 = arith.constant 0 : index
    %116 = vector.load %arg10[%c104, %c0_47] : memref<128x32xf32, #tpu.memory_space<vmem>>, vector<8x32xf32>
    tpu.vector_store %arg10[%c104, %c0_47], %115 {strides = array<i32>} : memref<128x32xf32, #tpu.memory_space<vmem>>, vector<8x32xf32>,
    %cst_48 = arith.constant 0.000000e+00 : f32
    %117 = vector.broadcast %cst_48 : f32 to vector<8x32xf32>
    %118 = arith.select %113, %117, %111 : vector<8x32xi1>, vector<8x32xf32>
    %119 = arith.addf %118, %5 : vector<8x32xf32>
    %cst_49 = arith.constant 1.000000e+00 : f32
    %120 = vector.broadcast %cst_49 : f32 to vector<8x32xf32>
    %121 = arith.cmpf oge, %119, %120 : vector<8x32xf32>
    %122 = arith.extui %121 : vector<8x32xi1> to vector<8x32xi32>
    %123 = arith.sitofp %122 : vector<8x32xi32> to vector<8x32xf32>
    %c112 = arith.constant 112 : index
    %c0_50 = arith.constant 0 : index
    %124 = vector.load %arg10[%c112, %c0_50] : memref<128x32xf32, #tpu.memory_space<vmem>>, vector<8x32xf32>
    tpu.vector_store %arg10[%c112, %c0_50], %123 {strides = array<i32>} : memref<128x32xf32, #tpu.memory_space<vmem>>, vector<8x32xf32>,
    %cst_51 = arith.constant 0.000000e+00 : f32
    %125 = vector.broadcast %cst_51 : f32 to vector<8x32xf32>
    %126 = arith.select %121, %125, %119 : vector<8x32xi1>, vector<8x32xf32>
    %127 = arith.addf %126, %5 : vector<8x32xf32>
    %cst_52 = arith.constant 1.000000e+00 : f32
    %128 = vector.broadcast %cst_52 : f32 to vector<8x32xf32>
    %129 = arith.cmpf oge, %127, %128 : vector<8x32xf32>
    %130 = arith.extui %129 : vector<8x32xi1> to vector<8x32xi32>
    %131 = arith.sitofp %130 : vector<8x32xi32> to vector<8x32xf32>
    %c120 = arith.constant 120 : index
    %c0_53 = arith.constant 0 : index
    %132 = vector.load %arg10[%c120, %c0_53] : memref<128x32xf32, #tpu.memory_space<vmem>>, vector<8x32xf32>
    tpu.vector_store %arg10[%c120, %c0_53], %131 {strides = array<i32>} : memref<128x32xf32, #tpu.memory_space<vmem>>, vector<8x32xf32>,
    %c0_54 = arith.constant 0 : index
    %c0_55 = arith.constant 0 : index
    %133 = vector.load %arg10[%c0_54, %c0_55] : memref<128x32xf32, #tpu.memory_space<vmem>>, vector<128x32xf32>
    %c0_56 = arith.constant 0 : index
    %c0_57 = arith.constant 0 : index
    %134 = vector.load %arg3[%c0_56, %c0_57] : memref<32x32xf32, #tpu.memory_space<vmem>>, vector<32x32xf32>
    %cst_58 = arith.constant dense<0.000000e+00> : vector<128x32xf32>
    %135 = tpu.matmul %133, %134, %cst_58 {dimension_numbers = #tpu.dot_dimension_numbers<[1], [0], [0], [1], [0, 0, 1, 1], [], []>} : vector<128x32xf32>, vector<32x32xf32>, vector<128x32xf32> -> vector<128x32xf32>
    %c0_59 = arith.constant 0 : index
    %c0_60 = arith.constant 0 : index
    %136 = vector.load %arg4[%c0_59, %c0_60] : memref<1x32xf32, #tpu.memory_space<vmem>>, vector<1x32xf32>
    %137 = vector.broadcast %136 : vector<1x32xf32> to vector<128x32xf32>
    %138 = arith.addf %135, %137 : vector<128x32xf32>
    %cst_61 = arith.constant 0.000000e+00 : f32
    %139 = vector.broadcast %cst_61 : f32 to vector<8x32xf32>
    %140 = vector.extract_strided_slice %138 {offsets = [0, 0], sizes = [8, 32], strides = [1, 1]} : vector<128x32xf32> to vector<8x32xf32>
    %141 = arith.addf %139, %140 : vector<8x32xf32>
    %cst_62 = arith.constant 1.000000e+00 : f32
    %142 = vector.broadcast %cst_62 : f32 to vector<8x32xf32>
    %143 = arith.cmpf oge, %141, %142 : vector<8x32xf32>
    %144 = arith.extui %143 : vector<8x32xi1> to vector<8x32xi32>
    %145 = arith.sitofp %144 : vector<8x32xi32> to vector<8x32xf32>
    %c0_63 = arith.constant 0 : index
    %c0_64 = arith.constant 0 : index
    %146 = vector.load %arg11[%c0_63, %c0_64] : memref<128x32xf32, #tpu.memory_space<vmem>>, vector<8x32xf32>
    tpu.vector_store %arg11[%c0_63, %c0_64], %145 {strides = array<i32>} : memref<128x32xf32, #tpu.memory_space<vmem>>, vector<8x32xf32>,
    %cst_65 = arith.constant 0.000000e+00 : f32
    %147 = vector.broadcast %cst_65 : f32 to vector<8x32xf32>
    %148 = arith.select %143, %147, %141 : vector<8x32xi1>, vector<8x32xf32>
    %149 = vector.extract_strided_slice %138 {offsets = [8, 0], sizes = [8, 32], strides = [1, 1]} : vector<128x32xf32> to vector<8x32xf32>
    %150 = arith.addf %148, %149 : vector<8x32xf32>
    %cst_66 = arith.constant 1.000000e+00 : f32
    %151 = vector.broadcast %cst_66 : f32 to vector<8x32xf32>
    %152 = arith.cmpf oge, %150, %151 : vector<8x32xf32>
    %153 = arith.extui %152 : vector<8x32xi1> to vector<8x32xi32>
    %154 = arith.sitofp %153 : vector<8x32xi32> to vector<8x32xf32>
    %c8_67 = arith.constant 8 : index
    %c0_68 = arith.constant 0 : index
    %155 = vector.load %arg11[%c8_67, %c0_68] : memref<128x32xf32, #tpu.memory_space<vmem>>, vector<8x32xf32>
    tpu.vector_store %arg11[%c8_67, %c0_68], %154 {strides = array<i32>} : memref<128x32xf32, #tpu.memory_space<vmem>>, vector<8x32xf32>,
    %cst_69 = arith.constant 0.000000e+00 : f32
    %156 = vector.broadcast %cst_69 : f32 to vector<8x32xf32>
    %157 = arith.select %152, %156, %150 : vector<8x32xi1>, vector<8x32xf32>
    %158 = vector.extract_strided_slice %138 {offsets = [16, 0], sizes = [8, 32], strides = [1, 1]} : vector<128x32xf32> to vector<8x32xf32>
    %159 = arith.addf %157, %158 : vector<8x32xf32>
    %cst_70 = arith.constant 1.000000e+00 : f32
    %160 = vector.broadcast %cst_70 : f32 to vector<8x32xf32>
    %161 = arith.cmpf oge, %159, %160 : vector<8x32xf32>
    %162 = arith.extui %161 : vector<8x32xi1> to vector<8x32xi32>
    %163 = arith.sitofp %162 : vector<8x32xi32> to vector<8x32xf32>
    %c16_71 = arith.constant 16 : index
    %c0_72 = arith.constant 0 : index
    %164 = vector.load %arg11[%c16_71, %c0_72] : memref<128x32xf32, #tpu.memory_space<vmem>>, vector<8x32xf32>
    tpu.vector_store %arg11[%c16_71, %c0_72], %163 {strides = array<i32>} : memref<128x32xf32, #tpu.memory_space<vmem>>, vector<8x32xf32>,
    %cst_73 = arith.constant 0.000000e+00 : f32
    %165 = vector.broadcast %cst_73 : f32 to vector<8x32xf32>
    %166 = arith.select %161, %165, %159 : vector<8x32xi1>, vector<8x32xf32>
    %167 = vector.extract_strided_slice %138 {offsets = [24, 0], sizes = [8, 32], strides = [1, 1]} : vector<128x32xf32> to vector<8x32xf32>
    %168 = arith.addf %166, %167 : vector<8x32xf32>
    %cst_74 = arith.constant 1.000000e+00 : f32
    %169 = vector.broadcast %cst_74 : f32 to vector<8x32xf32>
    %170 = arith.cmpf oge, %168, %169 : vector<8x32xf32>
    %171 = arith.extui %170 : vector<8x32xi1> to vector<8x32xi32>
    %172 = arith.sitofp %171 : vector<8x32xi32> to vector<8x32xf32>
    %c24_75 = arith.constant 24 : index
    %c0_76 = arith.constant 0 : index
    %173 = vector.load %arg11[%c24_75, %c0_76] : memref<128x32xf32, #tpu.memory_space<vmem>>, vector<8x32xf32>
    tpu.vector_store %arg11[%c24_75, %c0_76], %172 {strides = array<i32>} : memref<128x32xf32, #tpu.memory_space<vmem>>, vector<8x32xf32>,
    %cst_77 = arith.constant 0.000000e+00 : f32
    %174 = vector.broadcast %cst_77 : f32 to vector<8x32xf32>
    %175 = arith.select %170, %174, %168 : vector<8x32xi1>, vector<8x32xf32>
    %176 = vector.extract_strided_slice %138 {offsets = [32, 0], sizes = [8, 32], strides = [1, 1]} : vector<128x32xf32> to vector<8x32xf32>
    %177 = arith.addf %175, %176 : vector<8x32xf32>
    %cst_78 = arith.constant 1.000000e+00 : f32
    %178 = vector.broadcast %cst_78 : f32 to vector<8x32xf32>
    %179 = arith.cmpf oge, %177, %178 : vector<8x32xf32>
    %180 = arith.extui %179 : vector<8x32xi1> to vector<8x32xi32>
    %181 = arith.sitofp %180 : vector<8x32xi32> to vector<8x32xf32>
    %c32_79 = arith.constant 32 : index
    %c0_80 = arith.constant 0 : index
    %182 = vector.load %arg11[%c32_79, %c0_80] : memref<128x32xf32, #tpu.memory_space<vmem>>, vector<8x32xf32>
    tpu.vector_store %arg11[%c32_79, %c0_80], %181 {strides = array<i32>} : memref<128x32xf32, #tpu.memory_space<vmem>>, vector<8x32xf32>,
    %cst_81 = arith.constant 0.000000e+00 : f32
    %183 = vector.broadcast %cst_81 : f32 to vector<8x32xf32>
    %184 = arith.select %179, %183, %177 : vector<8x32xi1>, vector<8x32xf32>
    %185 = vector.extract_strided_slice %138 {offsets = [40, 0], sizes = [8, 32], strides = [1, 1]} : vector<128x32xf32> to vector<8x32xf32>
    %186 = arith.addf %184, %185 : vector<8x32xf32>
    %cst_82 = arith.constant 1.000000e+00 : f32
    %187 = vector.broadcast %cst_82 : f32 to vector<8x32xf32>
    %188 = arith.cmpf oge, %186, %187 : vector<8x32xf32>
    %189 = arith.extui %188 : vector<8x32xi1> to vector<8x32xi32>
    %190 = arith.sitofp %189 : vector<8x32xi32> to vector<8x32xf32>
    %c40_83 = arith.constant 40 : index
    %c0_84 = arith.constant 0 : index
    %191 = vector.load %arg11[%c40_83, %c0_84] : memref<128x32xf32, #tpu.memory_space<vmem>>, vector<8x32xf32>
    tpu.vector_store %arg11[%c40_83, %c0_84], %190 {strides = array<i32>} : memref<128x32xf32, #tpu.memory_space<vmem>>, vector<8x32xf32>,
    %cst_85 = arith.constant 0.000000e+00 : f32
    %192 = vector.broadcast %cst_85 : f32 to vector<8x32xf32>
    %193 = arith.select %188, %192, %186 : vector<8x32xi1>, vector<8x32xf32>
    %194 = vector.extract_strided_slice %138 {offsets = [48, 0], sizes = [8, 32], strides = [1, 1]} : vector<128x32xf32> to vector<8x32xf32>
    %195 = arith.addf %193, %194 : vector<8x32xf32>
    %cst_86 = arith.constant 1.000000e+00 : f32
    %196 = vector.broadcast %cst_86 : f32 to vector<8x32xf32>
    %197 = arith.cmpf oge, %195, %196 : vector<8x32xf32>
    %198 = arith.extui %197 : vector<8x32xi1> to vector<8x32xi32>
    %199 = arith.sitofp %198 : vector<8x32xi32> to vector<8x32xf32>
    %c48_87 = arith.constant 48 : index
    %c0_88 = arith.constant 0 : index
    %200 = vector.load %arg11[%c48_87, %c0_88] : memref<128x32xf32, #tpu.memory_space<vmem>>, vector<8x32xf32>
    tpu.vector_store %arg11[%c48_87, %c0_88], %199 {strides = array<i32>} : memref<128x32xf32, #tpu.memory_space<vmem>>, vector<8x32xf32>,
    %cst_89 = arith.constant 0.000000e+00 : f32
    %201 = vector.broadcast %cst_89 : f32 to vector<8x32xf32>
    %202 = arith.select %197, %201, %195 : vector<8x32xi1>, vector<8x32xf32>
    %203 = vector.extract_strided_slice %138 {offsets = [56, 0], sizes = [8, 32], strides = [1, 1]} : vector<128x32xf32> to vector<8x32xf32>
    %204 = arith.addf %202, %203 : vector<8x32xf32>
    %cst_90 = arith.constant 1.000000e+00 : f32
    %205 = vector.broadcast %cst_90 : f32 to vector<8x32xf32>
    %206 = arith.cmpf oge, %204, %205 : vector<8x32xf32>
    %207 = arith.extui %206 : vector<8x32xi1> to vector<8x32xi32>
    %208 = arith.sitofp %207 : vector<8x32xi32> to vector<8x32xf32>
    %c56_91 = arith.constant 56 : index
    %c0_92 = arith.constant 0 : index
    %209 = vector.load %arg11[%c56_91, %c0_92] : memref<128x32xf32, #tpu.memory_space<vmem>>, vector<8x32xf32>
    tpu.vector_store %arg11[%c56_91, %c0_92], %208 {strides = array<i32>} : memref<128x32xf32, #tpu.memory_space<vmem>>, vector<8x32xf32>,
    %cst_93 = arith.constant 0.000000e+00 : f32
    %210 = vector.broadcast %cst_93 : f32 to vector<8x32xf32>
    %211 = arith.select %206, %210, %204 : vector<8x32xi1>, vector<8x32xf32>
    %212 = vector.extract_strided_slice %138 {offsets = [64, 0], sizes = [8, 32], strides = [1, 1]} : vector<128x32xf32> to vector<8x32xf32>
    %213 = arith.addf %211, %212 : vector<8x32xf32>
    %cst_94 = arith.constant 1.000000e+00 : f32
    %214 = vector.broadcast %cst_94 : f32 to vector<8x32xf32>
    %215 = arith.cmpf oge, %213, %214 : vector<8x32xf32>
    %216 = arith.extui %215 : vector<8x32xi1> to vector<8x32xi32>
    %217 = arith.sitofp %216 : vector<8x32xi32> to vector<8x32xf32>
    %c64_95 = arith.constant 64 : index
    %c0_96 = arith.constant 0 : index
    %218 = vector.load %arg11[%c64_95, %c0_96] : memref<128x32xf32, #tpu.memory_space<vmem>>, vector<8x32xf32>
    tpu.vector_store %arg11[%c64_95, %c0_96], %217 {strides = array<i32>} : memref<128x32xf32, #tpu.memory_space<vmem>>, vector<8x32xf32>,
    %cst_97 = arith.constant 0.000000e+00 : f32
    %219 = vector.broadcast %cst_97 : f32 to vector<8x32xf32>
    %220 = arith.select %215, %219, %213 : vector<8x32xi1>, vector<8x32xf32>
    %221 = vector.extract_strided_slice %138 {offsets = [72, 0], sizes = [8, 32], strides = [1, 1]} : vector<128x32xf32> to vector<8x32xf32>
    %222 = arith.addf %220, %221 : vector<8x32xf32>
    %cst_98 = arith.constant 1.000000e+00 : f32
    %223 = vector.broadcast %cst_98 : f32 to vector<8x32xf32>
    %224 = arith.cmpf oge, %222, %223 : vector<8x32xf32>
    %225 = arith.extui %224 : vector<8x32xi1> to vector<8x32xi32>
    %226 = arith.sitofp %225 : vector<8x32xi32> to vector<8x32xf32>
    %c72_99 = arith.constant 72 : index
    %c0_100 = arith.constant 0 : index
    %227 = vector.load %arg11[%c72_99, %c0_100] : memref<128x32xf32, #tpu.memory_space<vmem>>, vector<8x32xf32>
    tpu.vector_store %arg11[%c72_99, %c0_100], %226 {strides = array<i32>} : memref<128x32xf32, #tpu.memory_space<vmem>>, vector<8x32xf32>,
    %cst_101 = arith.constant 0.000000e+00 : f32
    %228 = vector.broadcast %cst_101 : f32 to vector<8x32xf32>
    %229 = arith.select %224, %228, %222 : vector<8x32xi1>, vector<8x32xf32>
    %230 = vector.extract_strided_slice %138 {offsets = [80, 0], sizes = [8, 32], strides = [1, 1]} : vector<128x32xf32> to vector<8x32xf32>
    %231 = arith.addf %229, %230 : vector<8x32xf32>
    %cst_102 = arith.constant 1.000000e+00 : f32
    %232 = vector.broadcast %cst_102 : f32 to vector<8x32xf32>
    %233 = arith.cmpf oge, %231, %232 : vector<8x32xf32>
    %234 = arith.extui %233 : vector<8x32xi1> to vector<8x32xi32>
    %235 = arith.sitofp %234 : vector<8x32xi32> to vector<8x32xf32>
    %c80_103 = arith.constant 80 : index
    %c0_104 = arith.constant 0 : index
    %236 = vector.load %arg11[%c80_103, %c0_104] : memref<128x32xf32, #tpu.memory_space<vmem>>, vector<8x32xf32>
    tpu.vector_store %arg11[%c80_103, %c0_104], %235 {strides = array<i32>} : memref<128x32xf32, #tpu.memory_space<vmem>>, vector<8x32xf32>,
    %cst_105 = arith.constant 0.000000e+00 : f32
    %237 = vector.broadcast %cst_105 : f32 to vector<8x32xf32>
    %238 = arith.select %233, %237, %231 : vector<8x32xi1>, vector<8x32xf32>
    %239 = vector.extract_strided_slice %138 {offsets = [88, 0], sizes = [8, 32], strides = [1, 1]} : vector<128x32xf32> to vector<8x32xf32>
    %240 = arith.addf %238, %239 : vector<8x32xf32>
    %cst_106 = arith.constant 1.000000e+00 : f32
    %241 = vector.broadcast %cst_106 : f32 to vector<8x32xf32>
    %242 = arith.cmpf oge, %240, %241 : vector<8x32xf32>
    %243 = arith.extui %242 : vector<8x32xi1> to vector<8x32xi32>
    %244 = arith.sitofp %243 : vector<8x32xi32> to vector<8x32xf32>
    %c88_107 = arith.constant 88 : index
    %c0_108 = arith.constant 0 : index
    %245 = vector.load %arg11[%c88_107, %c0_108] : memref<128x32xf32, #tpu.memory_space<vmem>>, vector<8x32xf32>
    tpu.vector_store %arg11[%c88_107, %c0_108], %244 {strides = array<i32>} : memref<128x32xf32, #tpu.memory_space<vmem>>, vector<8x32xf32>,
    %cst_109 = arith.constant 0.000000e+00 : f32
    %246 = vector.broadcast %cst_109 : f32 to vector<8x32xf32>
    %247 = arith.select %242, %246, %240 : vector<8x32xi1>, vector<8x32xf32>
    %248 = vector.extract_strided_slice %138 {offsets = [96, 0], sizes = [8, 32], strides = [1, 1]} : vector<128x32xf32> to vector<8x32xf32>
    %249 = arith.addf %247, %248 : vector<8x32xf32>
    %cst_110 = arith.constant 1.000000e+00 : f32
    %250 = vector.broadcast %cst_110 : f32 to vector<8x32xf32>
    %251 = arith.cmpf oge, %249, %250 : vector<8x32xf32>
    %252 = arith.extui %251 : vector<8x32xi1> to vector<8x32xi32>
    %253 = arith.sitofp %252 : vector<8x32xi32> to vector<8x32xf32>
    %c96_111 = arith.constant 96 : index
    %c0_112 = arith.constant 0 : index
    %254 = vector.load %arg11[%c96_111, %c0_112] : memref<128x32xf32, #tpu.memory_space<vmem>>, vector<8x32xf32>
    tpu.vector_store %arg11[%c96_111, %c0_112], %253 {strides = array<i32>} : memref<128x32xf32, #tpu.memory_space<vmem>>, vector<8x32xf32>,
    %cst_113 = arith.constant 0.000000e+00 : f32
    %255 = vector.broadcast %cst_113 : f32 to vector<8x32xf32>
    %256 = arith.select %251, %255, %249 : vector<8x32xi1>, vector<8x32xf32>
    %257 = vector.extract_strided_slice %138 {offsets = [104, 0], sizes = [8, 32], strides = [1, 1]} : vector<128x32xf32> to vector<8x32xf32>
    %258 = arith.addf %256, %257 : vector<8x32xf32>
    %cst_114 = arith.constant 1.000000e+00 : f32
    %259 = vector.broadcast %cst_114 : f32 to vector<8x32xf32>
    %260 = arith.cmpf oge, %258, %259 : vector<8x32xf32>
    %261 = arith.extui %260 : vector<8x32xi1> to vector<8x32xi32>
    %262 = arith.sitofp %261 : vector<8x32xi32> to vector<8x32xf32>
    %c104_115 = arith.constant 104 : index
    %c0_116 = arith.constant 0 : index
    %263 = vector.load %arg11[%c104_115, %c0_116] : memref<128x32xf32, #tpu.memory_space<vmem>>, vector<8x32xf32>
    tpu.vector_store %arg11[%c104_115, %c0_116], %262 {strides = array<i32>} : memref<128x32xf32, #tpu.memory_space<vmem>>, vector<8x32xf32>,
    %cst_117 = arith.constant 0.000000e+00 : f32
    %264 = vector.broadcast %cst_117 : f32 to vector<8x32xf32>
    %265 = arith.select %260, %264, %258 : vector<8x32xi1>, vector<8x32xf32>
    %266 = vector.extract_strided_slice %138 {offsets = [112, 0], sizes = [8, 32], strides = [1, 1]} : vector<128x32xf32> to vector<8x32xf32>
    %267 = arith.addf %265, %266 : vector<8x32xf32>
    %cst_118 = arith.constant 1.000000e+00 : f32
    %268 = vector.broadcast %cst_118 : f32 to vector<8x32xf32>
    %269 = arith.cmpf oge, %267, %268 : vector<8x32xf32>
    %270 = arith.extui %269 : vector<8x32xi1> to vector<8x32xi32>
    %271 = arith.sitofp %270 : vector<8x32xi32> to vector<8x32xf32>
    %c112_119 = arith.constant 112 : index
    %c0_120 = arith.constant 0 : index
    %272 = vector.load %arg11[%c112_119, %c0_120] : memref<128x32xf32, #tpu.memory_space<vmem>>, vector<8x32xf32>
    tpu.vector_store %arg11[%c112_119, %c0_120], %271 {strides = array<i32>} : memref<128x32xf32, #tpu.memory_space<vmem>>, vector<8x32xf32>,
    %cst_121 = arith.constant 0.000000e+00 : f32
    %273 = vector.broadcast %cst_121 : f32 to vector<8x32xf32>
    %274 = arith.select %269, %273, %267 : vector<8x32xi1>, vector<8x32xf32>
    %275 = vector.extract_strided_slice %138 {offsets = [120, 0], sizes = [8, 32], strides = [1, 1]} : vector<128x32xf32> to vector<8x32xf32>
    %276 = arith.addf %274, %275 : vector<8x32xf32>
    %cst_122 = arith.constant 1.000000e+00 : f32
    %277 = vector.broadcast %cst_122 : f32 to vector<8x32xf32>
    %278 = arith.cmpf oge, %276, %277 : vector<8x32xf32>
    %279 = arith.extui %278 : vector<8x32xi1> to vector<8x32xi32>
    %280 = arith.sitofp %279 : vector<8x32xi32> to vector<8x32xf32>
    %c120_123 = arith.constant 120 : index
    %c0_124 = arith.constant 0 : index
    %281 = vector.load %arg11[%c120_123, %c0_124] : memref<128x32xf32, #tpu.memory_space<vmem>>, vector<8x32xf32>
    tpu.vector_store %arg11[%c120_123, %c0_124], %280 {strides = array<i32>} : memref<128x32xf32, #tpu.memory_space<vmem>>, vector<8x32xf32>,
    %c0_125 = arith.constant 0 : index
    %c0_126 = arith.constant 0 : index
    %282 = vector.load %arg11[%c0_125, %c0_126] : memref<128x32xf32, #tpu.memory_space<vmem>>, vector<128x32xf32>
    %c0_127 = arith.constant 0 : index
    %c0_128 = arith.constant 0 : index
    %283 = vector.load %arg5[%c0_127, %c0_128] : memref<32x32xf32, #tpu.memory_space<vmem>>, vector<32x32xf32>
    %cst_129 = arith.constant dense<0.000000e+00> : vector<128x32xf32>
    %284 = tpu.matmul %282, %283, %cst_129 {dimension_numbers = #tpu.dot_dimension_numbers<[1], [0], [0], [1], [0, 0, 1, 1], [], []>} : vector<128x32xf32>, vector<32x32xf32>, vector<128x32xf32> -> vector<128x32xf32>
    %c0_130 = arith.constant 0 : index
    %c0_131 = arith.constant 0 : index
    %285 = vector.load %arg6[%c0_130, %c0_131] : memref<1x32xf32, #tpu.memory_space<vmem>>, vector<1x32xf32>
    %286 = vector.broadcast %285 : vector<1x32xf32> to vector<128x32xf32>
    %287 = arith.addf %284, %286 : vector<128x32xf32>
    %cst_132 = arith.constant 0.000000e+00 : f32
    %288 = vector.broadcast %cst_132 : f32 to vector<8x32xf32>
    %cst_133 = arith.constant 0.000000e+00 : f32
    %289 = vector.broadcast %cst_133 : f32 to vector<8x32xf32>
    %290 = vector.extract_strided_slice %287 {offsets = [0, 0], sizes = [8, 32], strides = [1, 1]} : vector<128x32xf32> to vector<8x32xf32>
    %291 = arith.addf %288, %290 : vector<8x32xf32>
    %cst_134 = arith.constant 1.000000e+00 : f32
    %292 = vector.broadcast %cst_134 : f32 to vector<8x32xf32>
    %293 = arith.cmpf oge, %291, %292 : vector<8x32xf32>
    %294 = arith.extui %293 : vector<8x32xi1> to vector<8x32xi32>
    %295 = arith.sitofp %294 : vector<8x32xi32> to vector<8x32xf32>
    %cst_135 = arith.constant 1.52587891E-5 : f32
    %296 = vector.broadcast %cst_135 : f32 to vector<8x32xf32>
    %297 = arith.mulf %296, %295 : vector<8x32xf32>
    %298 = arith.addf %289, %297 : vector<8x32xf32>
    %cst_136 = arith.constant 0.000000e+00 : f32
    %299 = vector.broadcast %cst_136 : f32 to vector<8x32xf32>
    %300 = arith.select %293, %299, %291 : vector<8x32xi1>, vector<8x32xf32>
    %301 = vector.extract_strided_slice %287 {offsets = [8, 0], sizes = [8, 32], strides = [1, 1]} : vector<128x32xf32> to vector<8x32xf32>
    %302 = arith.addf %300, %301 : vector<8x32xf32>
    %cst_137 = arith.constant 1.000000e+00 : f32
    %303 = vector.broadcast %cst_137 : f32 to vector<8x32xf32>
    %304 = arith.cmpf oge, %302, %303 : vector<8x32xf32>
    %305 = arith.extui %304 : vector<8x32xi1> to vector<8x32xi32>
    %306 = arith.sitofp %305 : vector<8x32xi32> to vector<8x32xf32>
    %cst_138 = arith.constant 3.05175781E-5 : f32
    %307 = vector.broadcast %cst_138 : f32 to vector<8x32xf32>
    %308 = arith.mulf %307, %306 : vector<8x32xf32>
    %309 = arith.addf %298, %308 : vector<8x32xf32>
    %cst_139 = arith.constant 0.000000e+00 : f32
    %310 = vector.broadcast %cst_139 : f32 to vector<8x32xf32>
    %311 = arith.select %304, %310, %302 : vector<8x32xi1>, vector<8x32xf32>
    %312 = vector.extract_strided_slice %287 {offsets = [16, 0], sizes = [8, 32], strides = [1, 1]} : vector<128x32xf32> to vector<8x32xf32>
    %313 = arith.addf %311, %312 : vector<8x32xf32>
    %cst_140 = arith.constant 1.000000e+00 : f32
    %314 = vector.broadcast %cst_140 : f32 to vector<8x32xf32>
    %315 = arith.cmpf oge, %313, %314 : vector<8x32xf32>
    %316 = arith.extui %315 : vector<8x32xi1> to vector<8x32xi32>
    %317 = arith.sitofp %316 : vector<8x32xi32> to vector<8x32xf32>
    %cst_141 = arith.constant 6.10351563E-5 : f32
    %318 = vector.broadcast %cst_141 : f32 to vector<8x32xf32>
    %319 = arith.mulf %318, %317 : vector<8x32xf32>
    %320 = arith.addf %309, %319 : vector<8x32xf32>
    %cst_142 = arith.constant 0.000000e+00 : f32
    %321 = vector.broadcast %cst_142 : f32 to vector<8x32xf32>
    %322 = arith.select %315, %321, %313 : vector<8x32xi1>, vector<8x32xf32>
    %323 = vector.extract_strided_slice %287 {offsets = [24, 0], sizes = [8, 32], strides = [1, 1]} : vector<128x32xf32> to vector<8x32xf32>
    %324 = arith.addf %322, %323 : vector<8x32xf32>
    %cst_143 = arith.constant 1.000000e+00 : f32
    %325 = vector.broadcast %cst_143 : f32 to vector<8x32xf32>
    %326 = arith.cmpf oge, %324, %325 : vector<8x32xf32>
    %327 = arith.extui %326 : vector<8x32xi1> to vector<8x32xi32>
    %328 = arith.sitofp %327 : vector<8x32xi32> to vector<8x32xf32>
    %cst_144 = arith.constant 1.22070313E-4 : f32
    %329 = vector.broadcast %cst_144 : f32 to vector<8x32xf32>
    %330 = arith.mulf %329, %328 : vector<8x32xf32>
    %331 = arith.addf %320, %330 : vector<8x32xf32>
    %cst_145 = arith.constant 0.000000e+00 : f32
    %332 = vector.broadcast %cst_145 : f32 to vector<8x32xf32>
    %333 = arith.select %326, %332, %324 : vector<8x32xi1>, vector<8x32xf32>
    %334 = vector.extract_strided_slice %287 {offsets = [32, 0], sizes = [8, 32], strides = [1, 1]} : vector<128x32xf32> to vector<8x32xf32>
    %335 = arith.addf %333, %334 : vector<8x32xf32>
    %cst_146 = arith.constant 1.000000e+00 : f32
    %336 = vector.broadcast %cst_146 : f32 to vector<8x32xf32>
    %337 = arith.cmpf oge, %335, %336 : vector<8x32xf32>
    %338 = arith.extui %337 : vector<8x32xi1> to vector<8x32xi32>
    %339 = arith.sitofp %338 : vector<8x32xi32> to vector<8x32xf32>
    %cst_147 = arith.constant 2.44140625E-4 : f32
    %340 = vector.broadcast %cst_147 : f32 to vector<8x32xf32>
    %341 = arith.mulf %340, %339 : vector<8x32xf32>
    %342 = arith.addf %331, %341 : vector<8x32xf32>
    %cst_148 = arith.constant 0.000000e+00 : f32
    %343 = vector.broadcast %cst_148 : f32 to vector<8x32xf32>
    %344 = arith.select %337, %343, %335 : vector<8x32xi1>, vector<8x32xf32>
    %345 = vector.extract_strided_slice %287 {offsets = [40, 0], sizes = [8, 32], strides = [1, 1]} : vector<128x32xf32> to vector<8x32xf32>
    %346 = arith.addf %344, %345 : vector<8x32xf32>
    %cst_149 = arith.constant 1.000000e+00 : f32
    %347 = vector.broadcast %cst_149 : f32 to vector<8x32xf32>
    %348 = arith.cmpf oge, %346, %347 : vector<8x32xf32>
    %349 = arith.extui %348 : vector<8x32xi1> to vector<8x32xi32>
    %350 = arith.sitofp %349 : vector<8x32xi32> to vector<8x32xf32>
    %cst_150 = arith.constant 4.8828125E-4 : f32
    %351 = vector.broadcast %cst_150 : f32 to vector<8x32xf32>
    %352 = arith.mulf %351, %350 : vector<8x32xf32>
    %353 = arith.addf %342, %352 : vector<8x32xf32>
    %cst_151 = arith.constant 0.000000e+00 : f32
    %354 = vector.broadcast %cst_151 : f32 to vector<8x32xf32>
    %355 = arith.select %348, %354, %346 : vector<8x32xi1>, vector<8x32xf32>
    %356 = vector.extract_strided_slice %287 {offsets = [48, 0], sizes = [8, 32], strides = [1, 1]} : vector<128x32xf32> to vector<8x32xf32>
    %357 = arith.addf %355, %356 : vector<8x32xf32>
    %cst_152 = arith.constant 1.000000e+00 : f32
    %358 = vector.broadcast %cst_152 : f32 to vector<8x32xf32>
    %359 = arith.cmpf oge, %357, %358 : vector<8x32xf32>
    %360 = arith.extui %359 : vector<8x32xi1> to vector<8x32xi32>
    %361 = arith.sitofp %360 : vector<8x32xi32> to vector<8x32xf32>
    %cst_153 = arith.constant 9.765625E-4 : f32
    %362 = vector.broadcast %cst_153 : f32 to vector<8x32xf32>
    %363 = arith.mulf %362, %361 : vector<8x32xf32>
    %364 = arith.addf %353, %363 : vector<8x32xf32>
    %cst_154 = arith.constant 0.000000e+00 : f32
    %365 = vector.broadcast %cst_154 : f32 to vector<8x32xf32>
    %366 = arith.select %359, %365, %357 : vector<8x32xi1>, vector<8x32xf32>
    %367 = vector.extract_strided_slice %287 {offsets = [56, 0], sizes = [8, 32], strides = [1, 1]} : vector<128x32xf32> to vector<8x32xf32>
    %368 = arith.addf %366, %367 : vector<8x32xf32>
    %cst_155 = arith.constant 1.000000e+00 : f32
    %369 = vector.broadcast %cst_155 : f32 to vector<8x32xf32>
    %370 = arith.cmpf oge, %368, %369 : vector<8x32xf32>
    %371 = arith.extui %370 : vector<8x32xi1> to vector<8x32xi32>
    %372 = arith.sitofp %371 : vector<8x32xi32> to vector<8x32xf32>
    %cst_156 = arith.constant 0.001953125 : f32
    %373 = vector.broadcast %cst_156 : f32 to vector<8x32xf32>
    %374 = arith.mulf %373, %372 : vector<8x32xf32>
    %375 = arith.addf %364, %374 : vector<8x32xf32>
    %cst_157 = arith.constant 0.000000e+00 : f32
    %376 = vector.broadcast %cst_157 : f32 to vector<8x32xf32>
    %377 = arith.select %370, %376, %368 : vector<8x32xi1>, vector<8x32xf32>
    %378 = vector.extract_strided_slice %287 {offsets = [64, 0], sizes = [8, 32], strides = [1, 1]} : vector<128x32xf32> to vector<8x32xf32>
    %379 = arith.addf %377, %378 : vector<8x32xf32>
    %cst_158 = arith.constant 1.000000e+00 : f32
    %380 = vector.broadcast %cst_158 : f32 to vector<8x32xf32>
    %381 = arith.cmpf oge, %379, %380 : vector<8x32xf32>
    %382 = arith.extui %381 : vector<8x32xi1> to vector<8x32xi32>
    %383 = arith.sitofp %382 : vector<8x32xi32> to vector<8x32xf32>
    %cst_159 = arith.constant 3.906250e-03 : f32
    %384 = vector.broadcast %cst_159 : f32 to vector<8x32xf32>
    %385 = arith.mulf %384, %383 : vector<8x32xf32>
    %386 = arith.addf %375, %385 : vector<8x32xf32>
    %cst_160 = arith.constant 0.000000e+00 : f32
    %387 = vector.broadcast %cst_160 : f32 to vector<8x32xf32>
    %388 = arith.select %381, %387, %379 : vector<8x32xi1>, vector<8x32xf32>
    %389 = vector.extract_strided_slice %287 {offsets = [72, 0], sizes = [8, 32], strides = [1, 1]} : vector<128x32xf32> to vector<8x32xf32>
    %390 = arith.addf %388, %389 : vector<8x32xf32>
    %cst_161 = arith.constant 1.000000e+00 : f32
    %391 = vector.broadcast %cst_161 : f32 to vector<8x32xf32>
    %392 = arith.cmpf oge, %390, %391 : vector<8x32xf32>
    %393 = arith.extui %392 : vector<8x32xi1> to vector<8x32xi32>
    %394 = arith.sitofp %393 : vector<8x32xi32> to vector<8x32xf32>
    %cst_162 = arith.constant 7.812500e-03 : f32
    %395 = vector.broadcast %cst_162 : f32 to vector<8x32xf32>
    %396 = arith.mulf %395, %394 : vector<8x32xf32>
    %397 = arith.addf %386, %396 : vector<8x32xf32>
    %cst_163 = arith.constant 0.000000e+00 : f32
    %398 = vector.broadcast %cst_163 : f32 to vector<8x32xf32>
    %399 = arith.select %392, %398, %390 : vector<8x32xi1>, vector<8x32xf32>
    %400 = vector.extract_strided_slice %287 {offsets = [80, 0], sizes = [8, 32], strides = [1, 1]} : vector<128x32xf32> to vector<8x32xf32>
    %401 = arith.addf %399, %400 : vector<8x32xf32>
    %cst_164 = arith.constant 1.000000e+00 : f32
    %402 = vector.broadcast %cst_164 : f32 to vector<8x32xf32>
    %403 = arith.cmpf oge, %401, %402 : vector<8x32xf32>
    %404 = arith.extui %403 : vector<8x32xi1> to vector<8x32xi32>
    %405 = arith.sitofp %404 : vector<8x32xi32> to vector<8x32xf32>
    %cst_165 = arith.constant 1.562500e-02 : f32
    %406 = vector.broadcast %cst_165 : f32 to vector<8x32xf32>
    %407 = arith.mulf %406, %405 : vector<8x32xf32>
    %408 = arith.addf %397, %407 : vector<8x32xf32>
    %cst_166 = arith.constant 0.000000e+00 : f32
    %409 = vector.broadcast %cst_166 : f32 to vector<8x32xf32>
    %410 = arith.select %403, %409, %401 : vector<8x32xi1>, vector<8x32xf32>
    %411 = vector.extract_strided_slice %287 {offsets = [88, 0], sizes = [8, 32], strides = [1, 1]} : vector<128x32xf32> to vector<8x32xf32>
    %412 = arith.addf %410, %411 : vector<8x32xf32>
    %cst_167 = arith.constant 1.000000e+00 : f32
    %413 = vector.broadcast %cst_167 : f32 to vector<8x32xf32>
    %414 = arith.cmpf oge, %412, %413 : vector<8x32xf32>
    %415 = arith.extui %414 : vector<8x32xi1> to vector<8x32xi32>
    %416 = arith.sitofp %415 : vector<8x32xi32> to vector<8x32xf32>
    %cst_168 = arith.constant 3.125000e-02 : f32
    %417 = vector.broadcast %cst_168 : f32 to vector<8x32xf32>
    %418 = arith.mulf %417, %416 : vector<8x32xf32>
    %419 = arith.addf %408, %418 : vector<8x32xf32>
    %cst_169 = arith.constant 0.000000e+00 : f32
    %420 = vector.broadcast %cst_169 : f32 to vector<8x32xf32>
    %421 = arith.select %414, %420, %412 : vector<8x32xi1>, vector<8x32xf32>
    %422 = vector.extract_strided_slice %287 {offsets = [96, 0], sizes = [8, 32], strides = [1, 1]} : vector<128x32xf32> to vector<8x32xf32>
    %423 = arith.addf %421, %422 : vector<8x32xf32>
    %cst_170 = arith.constant 1.000000e+00 : f32
    %424 = vector.broadcast %cst_170 : f32 to vector<8x32xf32>
    %425 = arith.cmpf oge, %423, %424 : vector<8x32xf32>
    %426 = arith.extui %425 : vector<8x32xi1> to vector<8x32xi32>
    %427 = arith.sitofp %426 : vector<8x32xi32> to vector<8x32xf32>
    %cst_171 = arith.constant 6.250000e-02 : f32
    %428 = vector.broadcast %cst_171 : f32 to vector<8x32xf32>
    %429 = arith.mulf %428, %427 : vector<8x32xf32>
    %430 = arith.addf %419, %429 : vector<8x32xf32>
    %cst_172 = arith.constant 0.000000e+00 : f32
    %431 = vector.broadcast %cst_172 : f32 to vector<8x32xf32>
    %432 = arith.select %425, %431, %423 : vector<8x32xi1>, vector<8x32xf32>
    %433 = vector.extract_strided_slice %287 {offsets = [104, 0], sizes = [8, 32], strides = [1, 1]} : vector<128x32xf32> to vector<8x32xf32>
    %434 = arith.addf %432, %433 : vector<8x32xf32>
    %cst_173 = arith.constant 1.000000e+00 : f32
    %435 = vector.broadcast %cst_173 : f32 to vector<8x32xf32>
    %436 = arith.cmpf oge, %434, %435 : vector<8x32xf32>
    %437 = arith.extui %436 : vector<8x32xi1> to vector<8x32xi32>
    %438 = arith.sitofp %437 : vector<8x32xi32> to vector<8x32xf32>
    %cst_174 = arith.constant 1.250000e-01 : f32
    %439 = vector.broadcast %cst_174 : f32 to vector<8x32xf32>
    %440 = arith.mulf %439, %438 : vector<8x32xf32>
    %441 = arith.addf %430, %440 : vector<8x32xf32>
    %cst_175 = arith.constant 0.000000e+00 : f32
    %442 = vector.broadcast %cst_175 : f32 to vector<8x32xf32>
    %443 = arith.select %436, %442, %434 : vector<8x32xi1>, vector<8x32xf32>
    %444 = vector.extract_strided_slice %287 {offsets = [112, 0], sizes = [8, 32], strides = [1, 1]} : vector<128x32xf32> to vector<8x32xf32>
    %445 = arith.addf %443, %444 : vector<8x32xf32>
    %cst_176 = arith.constant 1.000000e+00 : f32
    %446 = vector.broadcast %cst_176 : f32 to vector<8x32xf32>
    %447 = arith.cmpf oge, %445, %446 : vector<8x32xf32>
    %448 = arith.extui %447 : vector<8x32xi1> to vector<8x32xi32>
    %449 = arith.sitofp %448 : vector<8x32xi32> to vector<8x32xf32>
    %cst_177 = arith.constant 2.500000e-01 : f32
    %450 = vector.broadcast %cst_177 : f32 to vector<8x32xf32>
    %451 = arith.mulf %450, %449 : vector<8x32xf32>
    %452 = arith.addf %441, %451 : vector<8x32xf32>
    %cst_178 = arith.constant 0.000000e+00 : f32
    %453 = vector.broadcast %cst_178 : f32 to vector<8x32xf32>
    %454 = arith.select %447, %453, %445 : vector<8x32xi1>, vector<8x32xf32>
    %455 = vector.extract_strided_slice %287 {offsets = [120, 0], sizes = [8, 32], strides = [1, 1]} : vector<128x32xf32> to vector<8x32xf32>
    %456 = arith.addf %454, %455 : vector<8x32xf32>
    %cst_179 = arith.constant 1.000000e+00 : f32
    %457 = vector.broadcast %cst_179 : f32 to vector<8x32xf32>
    %458 = arith.cmpf oge, %456, %457 : vector<8x32xf32>
    %459 = arith.extui %458 : vector<8x32xi1> to vector<8x32xi32>
    %460 = arith.sitofp %459 : vector<8x32xi32> to vector<8x32xf32>
    %cst_180 = arith.constant 5.000000e-01 : f32
    %461 = vector.broadcast %cst_180 : f32 to vector<8x32xf32>
    %462 = arith.mulf %461, %460 : vector<8x32xf32>
    %463 = arith.addf %452, %462 : vector<8x32xf32>
    %c0_181 = arith.constant 0 : index
    %c0_182 = arith.constant 0 : index
    %464 = vector.load %arg7[%c0_181, %c0_182] : memref<32x4xf32, #tpu.memory_space<vmem>>, vector<32x4xf32>
    %cst_183 = arith.constant dense<0.000000e+00> : vector<8x4xf32>
    %465 = tpu.matmul %463, %464, %cst_183 {dimension_numbers = #tpu.dot_dimension_numbers<[1], [0], [0], [1], [0, 0, 1, 1], [], []>} : vector<8x32xf32>, vector<32x4xf32>, vector<8x4xf32> -> vector<8x4xf32>
    %c0_184 = arith.constant 0 : index
    %c0_185 = arith.constant 0 : index
    %466 = vector.load %arg8[%c0_184, %c0_185] : memref<1x4xf32, #tpu.memory_space<vmem>>, vector<1x4xf32>
    %cst_186 = arith.constant 0.999984741 : f32
    %467 = vector.broadcast %cst_186 : f32 to vector<1x4xf32>
    %468 = arith.mulf %467, %466 : vector<1x4xf32>
    %469 = vector.broadcast %468 : vector<1x4xf32> to vector<8x4xf32>
    %470 = arith.addf %465, %469 : vector<8x4xf32>
    %c0_187 = arith.constant 0 : index
    %c0_188 = arith.constant 0 : index
    %471 = vector.load %arg9[%c0_187, %c0_188] : memref<8x4xf32, #tpu.memory_space<vmem>>, vector<8x4xf32>
    tpu.vector_store %arg9[%c0_187, %c0_188], %470 {strides = array<i32>} : memref<8x4xf32, #tpu.memory_space<vmem>>, vector<8x4xf32>,
    return
  }
}

</mosaic_0001>

<bundles_post_ra>
// kernel: tpu_custom_call.1
= control target key start
LH: loop header
LB: loop body
LE: loop exit
PB: predicated region body
PF: predicated region fallthrough
CT: control target
= control target key end

     0   :  { %14 = vsyncpa [#allocation5], 0  ;;  %s1634_s0 = inlined_call_operand.hbm [shape: f32[8,32], index: 0, kind: input, shape index: {}]   ;;  %s1635_s1 = inlined_call_operand.vmem [shape: f32[32,32], index: 1, kind: input, shape index: {}]   ;;  %s1636_s2 = inlined_call_operand.vmem [shape: f32[1,32], index: 2, kind: input, shape index: {}]   ;;  %s1637_s3 = inlined_call_operand.hbm [shape: f32[32,32], index: 3, kind: input, shape index: {}]   ;;  %s1638_s4 = inlined_call_operand.vmem [shape: f32[1,32], index: 4, kind: input, shape index: {}]   ;;  %s1639_s5 = inlined_call_operand.hbm [shape: f32[32,32], index: 5, kind: input, shape index: {}]   ;;  %s1640_s6 = inlined_call_operand.vmem [shape: f32[1,32], index: 6, kind: input, shape index: {}]   ;;  %s1641_s7 = inlined_call_operand.vmem [shape: f32[32,4], index: 7, kind: input, shape index: {}]   ;;  %s1642_s8 = inlined_call_operand.vmem [shape: f32[1,4], index: 8, kind: input, shape index: {}]   ;;  %s1643_s9 = inlined_call_operand.vmem [shape: f32[8,4], index: 9, kind: output, shape index: {}]  }
   0x1   :  { %15 = vsyncpa [#allocation7], 0  ;;  %s1318_s30 = smov [#allocation6]   ;;  %s1248_s13 = scalar_lea.hbm %s1637_s3, 512 }
   0x2   :  { %s35_s10 = sshll.u32 %s1318_s30, 4  ;;  %p1249_p0 = scmp.ne.s32.totalorder %s1637_s3, %s1248_s13  ;;  %s36_s10 = int_to_ptr.vmem [resolvable:$true] %s35_s10 }
   0x3   :  { %p1252_p1 = scmp.lt.u32.totalorder %s1248_s13, %s1637_s3 }
   0x5   :  { %p1254_p2 = pnand %p1252_p1, %p1249_p0 }
   0x7   :  { %1257 = shalt.err (!%p1254_p2)
}
   0x8   :  { %s1258_s18 = scalar_lea.vmem %s36_s10, 512  ;;  %p1263_p4 = scmp.lt.s32.totalorder %s36_s10, %s36_s10 }
   0x9   :  { %p1259_p3 = scmp.ne.s32.totalorder %s36_s10, %s1258_s18  ;;  %p1264_p5 = scmp.lt.s32.totalorder %s1258_s18, %s1258_s18 }
   0xb   :  { %p1265_p6 = por %p1264_p5, %p1263_p4 }
   0xd   :  { %p1266_p7 = pnand %p1265_p6, %p1259_p3 }
   0xf   :  { %1269 = shalt.err (!%p1266_p7)
}
  0x10   :  { %s1319_s19 = smov 128   ;;  %s1320_s20 = smov 8  }
  0x11   :  { %41 = dma.hbm_to_vmem [thread:$0]  %s1637_s3, 512, %s36_s10, [#allocation7], %s1319_s19, %s1319_s19, %s1320_s20  }
  0x12   :  { %s1321_s23 = smov [#allocation4]   ;;  %s1322_s25 = smov [#allocation8]  }
  0x13   :  { %s22_s24 = sshll.u32 %s1321_s23, 4  ;;  %s49_s26 = sshll.u32 %s1322_s25, 4  ;;  %s23_s24 = int_to_ptr.vmem [resolvable:$true] %s22_s24  ;;  %s50_s26 = int_to_ptr.vmem [resolvable:$true] %s49_s26 }
  0x14   :  { %s1270_s29 = scalar_lea.hbm %s1634_s0, 128 }
  0x15   :  { %p1271_p8 = scmp.ne.s32.totalorder %s1634_s0, %s1270_s29  ;;  %p1274_p9 = scmp.lt.u32.totalorder %s1270_s29, %s1634_s0 }
  0x17   :  { %p1276_p10 = pnand %p1274_p9, %p1271_p8 }
  0x19   :  { %1279 = shalt.err (!%p1276_p10)
}
  0x1a   :  { %s1280_s3 = scalar_lea.vmem %s23_s24, 128  ;;  %p1285_p12 = scmp.lt.s32.totalorder %s23_s24, %s23_s24 }
  0x1b   :  { %p1281_p11 = scmp.ne.s32.totalorder %s23_s24, %s1280_s3  ;;  %p1286_p13 = scmp.lt.s32.totalorder %s1280_s3, %s1280_s3 }
  0x1d   :  { %p1287_p0 = por %p1286_p13, %p1285_p12 }
  0x1f   :  { %p1288_p1 = pnand %p1287_p0, %p1281_p11 }
  0x21   :  { %1291 = shalt.err (!%p1288_p1)
}
  0x22   :  { %25 = dma.hbm_to_vmem [thread:$0]  %s1634_s0, 128, %s23_s24, [#allocation5]  }
  0x23   :  { %s1292_s17 = scalar_lea.hbm %s1639_s5, 512 }
  0x24   :  { %p1293_p2 = scmp.ne.s32.totalorder %s1639_s5, %s1292_s17  ;;  %p1296_p3 = scmp.lt.u32.totalorder %s1292_s17, %s1639_s5 }
  0x26   :  { %p1298_p4 = pnand %p1296_p3, %p1293_p2 }
  0x28   :  { %1301 = shalt.err (!%p1298_p4)
}
  0x29   :  { %s1302_s25 = scalar_lea.vmem %s50_s26, 512  ;;  %p1307_p6 = scmp.lt.s32.totalorder %s50_s26, %s50_s26 }
  0x2a   :  { %p1303_p5 = scmp.ne.s32.totalorder %s50_s26, %s1302_s25  ;;  %p1308_p7 = scmp.lt.s32.totalorder %s1302_s25, %s1302_s25 }
  0x2c   :  { %p1309_p8 = por %p1308_p7, %p1307_p6 }
  0x2e   :  { %p1310_p9 = pnand %p1309_p8, %p1303_p5 }
  0x30   :  { %1313 = shalt.err (!%p1310_p9)
}
  0x31   :  { %55 = dma.hbm_to_vmem [thread:$0]  %s1639_s5, 512, %s50_s26, [#allocation7], %s1319_s19, %s1319_s19, %s1320_s20  }
  0x32   :  { %1314 = dma.done.wait [#allocation5], 128  }
  0x33   :  { %1315 = vsyncadd [#allocation5], 4294967168 }
  0x34   :  { %1316 = dma.done.wait [#allocation7], 1024  }
  0x35   :  { %1317 = vsyncadd [#allocation7], 4294966272  ;;  %v1323_v0 = vmov 0.0|0.0   ;;  %vm1324_vm0 = vmmov 0   ;;  %v1325_v1 = vmov 0.0   ;;  %v72_v2 = vld [vmem:[%s1635_s1] sm:$0xff] }
  0x36   :  { %1212 = vmatprep.subr.bf16.mxu0 %v1323_v0  ;;  %1134 = vmatprep.mubr.msk.f32.mxu0 %vm1324_vm0, %v1325_v1  ;;  %v73_v3 = vld [vmem:[%s1635_s1 + $0x8] sm:$0xff]  ;;  %v74_v4 = vld [vmem:[%s1635_s1 + $0x10] sm:$0xff]  ;;  %v75_v6 = vld [vmem:[%s1635_s1 + $0x18] sm:$0xff]  ;;  %vm83_vm1 = vcmask 261120  }
  0x37   :  { %v1213_v5 = vpack.c.bf16 %v73_v3, %v72_v2  ;;  %v1216_v7 = vpack.c.bf16 %v75_v6, %v74_v4  ;;  %v71_v8 = vld [vmem:[#allocation4] sm:$0xff]  ;;  %v268_v9 = vld [vmem:[#allocation6] sm:$0xff]  ;;  %v269_v10 = vld [vmem:[#allocation6 + $0x8] sm:$0xff] }
  0x38   :  { %v270_v11 = vld [vmem:[#allocation6 + $0x10] sm:$0xff]  ;;  %v1218_v12 = vpack.c.bf16 %v269_v10, %v268_v9  ;;  %v271_v13 = vld [vmem:[#allocation6 + $0x18] sm:$0xff] }
  0x39   :  { %1214 = vmatpush3.bf16.msra.mxu0 %v1213_v5  ;;  %v1222_v14 = vpack.c.bf16 %v271_v13, %v270_v11  ;;  %v991_v15 = vld [vmem:[%s1636_s2] ss:$0 sm:$0xff] }
  0x3a   :  { %1215 = vmatprep.subr.bf16.mxu0 %v1323_v0  ;;  %1219 = vmatprep.subr.bf16.mxu1 %v1218_v12 }
  0x3b   :  { %1221 = vmatpush3.bf16.msra.mxu1 %v1218_v12 }
  0x3c   :  { %1223 = vmatprep.subr.bf16.mxu1 %v1222_v14 }
  0x3d   :  { %1217 = vmatpush3.bf16.msra.mxu0 %v1216_v7 }
  0x3f   :  { %1225 = vmatpush3.bf16.msra.mxu1 %v1222_v14 }
  0x40   :  { %1135 = vmatmul.mubr.msk.f32.vlgmr.msra.gmra.mrb[0].mxu0 %vm83_vm1, %v71_v8  ;;  %1234 = vmatprep.subr.bf16.mxu1 %v1323_v0 }
 0x113   :  { %v153_v16 = vpop.f32.mrb[0].mxu0 }
 0x114   :  { %v1439_v17 = vadd.f32 %v991_v15, %v153_v16  ;;  %v1136_v18 = vpop.f32.mrb[1].mxu0 }
 0x116   :  { %vm158_vm2 = vcmp.ge.f32.partialorder %v1439_v17, 1.0 }
 0x117   :  { %v993_v19 = vsel %vm158_vm2, 1.0, %v1325_v1  ;;  %v162_v20 = vsel %vm158_vm2, 0.0, %v1439_v17 }
 0x118   :  { %161 = vst.msk [vmem:[#allocation2] sm:$0xff] %vm83_vm1, %v993_v19  ;;  %v163_v21 = vadd.f32 %v162_v20, %v1439_v17  ;;  %v583_v20 = vld [vmem:[#allocation8] sm:$0xff] }
 0x11a   :  { %vm164_vm3 = vcmp.ge.f32.partialorder %v163_v21, 1.0 }
 0x11b   :  { %v994_v22 = vsel %vm164_vm3, 1.0, %v1325_v1  ;;  %v168_v23 = vsel %vm164_vm3, 0.0, %v163_v21  ;;  %v584_v21 = vld [vmem:[#allocation8 + $0x8] sm:$0xff] }
 0x11c   :  { %167 = vst.msk [vmem:[#allocation2 + $0x8] sm:$0xff] %vm83_vm1, %v994_v22  ;;  %v169_v24 = vadd.f32 %v168_v23, %v1439_v17  ;;  %v585_v22 = vld [vmem:[#allocation8 + $0x10] sm:$0xff]  ;;  %v586_v23 = vld [vmem:[#allocation8 + $0x18] sm:$0xff] }
 0x11e   :  { %vm170_vm4 = vcmp.ge.f32.partialorder %v169_v24, 1.0 }
 0x11f   :  { %v252_v25 = vld [vmem:[#allocation2] sm:$0xff]  ;;  %v995_v26 = vsel %vm170_vm4, 1.0, %v1325_v1  ;;  %v174_v27 = vsel %vm170_vm4, 0.0, %v169_v24  ;;  %v1230_v24 = vpack.c.bf16 %v586_v23, %v585_v22 }
 0x120   :  { %1145 = vmatprep.mubr.msk.f32.mxu1 %vm83_vm1, %v252_v25  ;;  %173 = vst.msk [vmem:[#allocation2 + $0x10] sm:$0xff] %vm83_vm1, %v995_v26  ;;  %v175_v28 = vadd.f32 %v174_v27, %v1439_v17  ;;  %v1511_v25 = vld [vmem:[%s1638_s4] ss:$0 sm:$0xff] }
 0x122   :  { %vm176_vm5 = vcmp.ge.f32.partialorder %v175_v28, 1.0 }
 0x123   :  { %v253_v29 = vld [vmem:[#allocation2 + $0x8] sm:$0xff]  ;;  %v996_v30 = vsel %vm176_vm5, 1.0, %v1325_v1  ;;  %v180_v31 = vsel %vm176_vm5, 0.0, %v175_v28 }
 0x124   :  { %1146 = vmatmul.mubr.msk.f32.vlgmr.msra.gmra.mrb[0].mxu1 %vm83_vm1, %v253_v29  ;;  %179 = vst.msk [vmem:[#allocation2 + $0x18] sm:$0xff] %vm83_vm1, %v996_v30  ;;  %v181_v32 = vadd.f32 %v180_v31, %v1439_v17 }
 0x126   :  { %vm182_vm6 = vcmp.ge.f32.partialorder %v181_v32, 1.0 }
 0x127   :  { %v254_v33 = vld [vmem:[#allocation2 + $0x10] sm:$0xff]  ;;  %v997_v34 = vsel %vm182_vm6, 1.0, %v1325_v1  ;;  %v186_v35 = vsel %vm182_vm6, 0.0, %v181_v32 }
 0x128   :  { %1148 = vmatprep.mubr.msk.f32.mxu1 %vm83_vm1, %v254_v33  ;;  %185 = vst.msk [vmem:[#allocation2 + $0x20] sm:$0xff] %vm83_vm1, %v997_v34  ;;  %v187_v36 = vadd.f32 %v186_v35, %v1439_v17 }
 0x12a   :  { %vm188_vm7 = vcmp.ge.f32.partialorder %v187_v36, 1.0 }
 0x12b   :  { %v255_v37 = vld [vmem:[#allocation2 + $0x18] sm:$0xff]  ;;  %v998_v38 = vsel %vm188_vm7, 1.0, %v1325_v1  ;;  %v192_v39 = vsel %vm188_vm7, 0.0, %v187_v36 }
 0x12c   :  { %1149 = vmatmul.mubr.msk.f32.gmra.mrb[2].mxu1 %vm83_vm1, %v255_v37  ;;  %191 = vst.msk [vmem:[#allocation2 + $0x28] sm:$0xff] %vm83_vm1, %v998_v38  ;;  %v193_v40 = vadd.f32 %v192_v39, %v1439_v17 }
 0x12e   :  { %vm194_vm8 = vcmp.ge.f32.partialorder %v193_v40, 1.0 }
 0x12f   :  { %v256_v41 = vld [vmem:[#allocation2 + $0x20] sm:$0xff]  ;;  %v999_v42 = vsel %vm194_vm8, 1.0, %v1325_v1  ;;  %v198_v43 = vsel %vm194_vm8, 0.0, %v193_v40 }
 0x130   :  { %1151 = vmatprep.mubr.msk.f32.mxu1 %vm83_vm1, %v256_v41  ;;  %197 = vst.msk [vmem:[#allocation2 + $0x30] sm:$0xff] %vm83_vm1, %v999_v42  ;;  %v199_v44 = vadd.f32 %v198_v43, %v1439_v17 }
 0x132   :  { %vm200_vm9 = vcmp.ge.f32.partialorder %v199_v44, 1.0 }
 0x133   :  { %v257_v45 = vld [vmem:[#allocation2 + $0x28] sm:$0xff]  ;;  %v1000_v46 = vsel %vm200_vm9, 1.0, %v1325_v1  ;;  %v204_v47 = vsel %vm200_vm9, 0.0, %v199_v44 }
 0x134   :  { %1152 = vmatmul.mubr.msk.f32.gmra.mrb[4].mxu1 %vm83_vm1, %v257_v45  ;;  %203 = vst.msk [vmem:[#allocation2 + $0x38] sm:$0xff] %vm83_vm1, %v1000_v46  ;;  %v205_v48 = vadd.f32 %v204_v47, %v1439_v17 }
 0x136   :  { %vm206_vm10 = vcmp.ge.f32.partialorder %v205_v48, 1.0 }
 0x137   :  { %v258_v49 = vld [vmem:[#allocation2 + $0x30] sm:$0xff]  ;;  %v1001_v50 = vsel %vm206_vm10, 1.0, %v1325_v1  ;;  %v210_v51 = vsel %vm206_vm10, 0.0, %v205_v48 }
 0x138   :  { %1154 = vmatprep.mubr.msk.f32.mxu1 %vm83_vm1, %v258_v49  ;;  %209 = vst.msk [vmem:[#allocation2 + $0x40] sm:$0xff] %vm83_vm1, %v1001_v50  ;;  %v211_v52 = vadd.f32 %v210_v51, %v1439_v17 }
 0x13a   :  { %vm212_vm11 = vcmp.ge.f32.partialorder %v211_v52, 1.0 }
 0x13b   :  { %v259_v53 = vld [vmem:[#allocation2 + $0x38] sm:$0xff]  ;;  %v1002_v54 = vsel %vm212_vm11, 1.0, %v1325_v1  ;;  %v216_v55 = vsel %vm212_vm11, 0.0, %v211_v52 }
 0x13c   :  { %1155 = vmatmul.mubr.msk.f32.gmra.mrb[6].mxu1 %vm83_vm1, %v259_v53  ;;  %215 = vst.msk [vmem:[#allocation2 + $0x48] sm:$0xff] %vm83_vm1, %v1002_v54  ;;  %v217_v56 = vadd.f32 %v216_v55, %v1439_v17 }
 0x13e   :  { %vm218_vm12 = vcmp.ge.f32.partialorder %v217_v56, 1.0 }
 0x13f   :  { %v260_v57 = vld [vmem:[#allocation2 + $0x40] sm:$0xff]  ;;  %v1003_v58 = vsel %vm218_vm12, 1.0, %v1325_v1  ;;  %v222_v59 = vsel %vm218_vm12, 0.0, %v217_v56 }
 0x140   :  { %1157 = vmatprep.mubr.msk.f32.mxu1 %vm83_vm1, %v260_v57  ;;  %221 = vst.msk [vmem:[#allocation2 + $0x50] sm:$0xff] %vm83_vm1, %v1003_v58  ;;  %v223_v60 = vadd.f32 %v222_v59, %v1439_v17 }
 0x142   :  { %vm224_vm13 = vcmp.ge.f32.partialorder %v223_v60, 1.0 }
 0x143   :  { %v261_v61 = vld [vmem:[#allocation2 + $0x48] sm:$0xff]  ;;  %v1004_v62 = vsel %vm224_vm13, 1.0, %v1325_v1  ;;  %v228_v63 = vsel %vm224_vm13, 0.0, %v223_v60 }
 0x144   :  { %1158 = vmatmul.mubr.msk.f32.gmra.mrb[8].mxu1 %vm83_vm1, %v261_v61  ;;  %227 = vst.msk [vmem:[#allocation2 + $0x58] sm:$0xff] %vm83_vm1, %v1004_v62  ;;  %v229_v2 = vadd.f32 %v228_v63, %v1439_v17 }
 0x146   :  { %vm230_vm14 = vcmp.ge.f32.partialorder %v229_v2, 1.0 }
 0x147   :  { %v262_v3 = vld [vmem:[#allocation2 + $0x50] sm:$0xff]  ;;  %v1005_v4 = vsel %vm230_vm14, 1.0, %v1325_v1  ;;  %v234_v5 = vsel %vm230_vm14, 0.0, %v229_v2 }
 0x148   :  { %1160 = vmatprep.mubr.msk.f32.mxu1 %vm83_vm1, %v262_v3  ;;  %233 = vst.msk [vmem:[#allocation2 + $0x60] sm:$0xff] %vm83_vm1, %v1005_v4  ;;  %v235_v6 = vadd.f32 %v234_v5, %v1439_v17 }
 0x14a   :  { %vm236_vm15 = vcmp.ge.f32.partialorder %v235_v6, 1.0 }
 0x14b   :  { %v263_v7 = vld [vmem:[#allocation2 + $0x58] sm:$0xff]  ;;  %v1006_v8 = vsel %vm236_vm15, 1.0, %v1325_v1  ;;  %v240_v9 = vsel %vm236_vm15, 0.0, %v235_v6 }
 0x14c   :  { %1161 = vmatmul.mubr.msk.f32.gmra.mrb[10].mxu1 %vm83_vm1, %v263_v7  ;;  %239 = vst.msk [vmem:[#allocation2 + $0x68] sm:$0xff] %vm83_vm1, %v1006_v8  ;;  %v241_v10 = vadd.f32 %v240_v9, %v1439_v17 }
 0x14e   :  { %vm242_vm2 = vcmp.ge.f32.partialorder %v241_v10, 1.0 }
 0x14f   :  { %v264_v11 = vld [vmem:[#allocation2 + $0x60] sm:$0xff]  ;;  %v1007_v12 = vsel %vm242_vm2, 1.0, %v1325_v1  ;;  %v246_v13 = vsel %vm242_vm2, 0.0, %v241_v10 }
 0x150   :  { %1163 = vmatprep.mubr.msk.f32.mxu1 %vm83_vm1, %v264_v11  ;;  %245 = vst.msk [vmem:[#allocation2 + $0x70] sm:$0xff] %vm83_vm1, %v1007_v12  ;;  %v247_v14 = vadd.f32 %v246_v13, %v1439_v17  ;;  %v1226_v17 = vpack.c.bf16 %v584_v21, %v583_v20 }
 0x152   :  { %vm248_vm3 = vcmp.ge.f32.partialorder %v247_v14, 1.0  ;;  %1227 = vmatprep.subr.bf16.mxu0 %v1226_v17 }
 0x153   :  { %v265_v15 = vld [vmem:[#allocation2 + $0x68] sm:$0xff]  ;;  %v1008_v16 = vsel %vm248_vm3, 1.0, %v1325_v1  ;;  %1229 = vmatpush3.bf16.msra.mxu0 %v1226_v17 }
 0x154   :  { %1164 = vmatmul.mubr.msk.f32.gmra.mrb[12].mxu1 %vm83_vm1, %v265_v15  ;;  %251 = vst.msk [vmem:[#allocation2 + $0x78] sm:$0xff] %vm83_vm1, %v1008_v16  ;;  %1231 = vmatprep.subr.bf16.mxu0 %v1230_v24 }
 0x157   :  { %v266_v18 = vld [vmem:[#allocation2 + $0x70] sm:$0xff]  ;;  %1233 = vmatpush3.bf16.msra.mxu0 %v1230_v24 }
 0x158   :  { %1166 = vmatprep.mubr.msk.f32.mxu1 %vm83_vm1, %v266_v18 }
 0x15b   :  { %v267_v19 = vld [vmem:[#allocation2 + $0x78] sm:$0xff] }
 0x15c   :  { %1167 = vmatmul.mubr.msk.f32.gmra.mrb[14].mxu1 %vm83_vm1, %v267_v19 }
 0x15d   :  { %1209 = vmatprep.mubr.msk.f32.mxu1 %vm1324_vm0, %v1325_v1 }
 0x1f7   :  { %v1147_v26 = vpop.f32.mrb[0].mxu1 }
 0x1f8   :  { %v393_v27 = vpop.f32.mrb[1].mxu1  ;;  %v399_v29 = vadd.f32 %v1147_v26, %v1511_v25 }
 0x1f9   :  { %v394_v28 = vadd.f32 %v1511_v25, %v393_v27 }
 0x1fb   :  { %vm473_vm0 = vcmp.ge.f32.partialorder %v394_v28, 1.0 }
 0x1fc   :  { %v1026_v30 = vsel %vm473_vm0, 1.0, %v1325_v1  ;;  %v477_v31 = vsel %vm473_vm0, 0.0, %v394_v28 }
 0x1fd   :  { %476 = vst.msk [vmem:[#allocation3] sm:$0xff] %vm83_vm1, %v1026_v30  ;;  %v478_v32 = vadd.f32 %v477_v31, %v399_v29 }
 0x1ff   :  { %v1150_v33 = vpop.f32.mrb[2].mxu1  ;;  %vm479_vm4 = vcmp.ge.f32.partialorder %v478_v32, 1.0 }
 0x200   :  { %v403_v34 = vpop.f32.mrb[3].mxu1  ;;  %v1027_v35 = vsel %vm479_vm4, 1.0, %v1325_v1  ;;  %v483_v37 = vsel %vm479_vm4, 0.0, %v478_v32  ;;  %v409_v40 = vadd.f32 %v1150_v33, %v1511_v25 }
 0x201   :  { %v404_v36 = vadd.f32 %v1511_v25, %v403_v34  ;;  %482 = vst.msk [vmem:[#allocation3 + $0x8] sm:$0xff] %vm83_vm1, %v1027_v35 }
 0x203   :  { %v484_v38 = vadd.f32 %v483_v37, %v404_v36 }
 0x204   :  { %v567_v39 = vld [vmem:[#allocation3] sm:$0xff] }
 0x205   :  { %vm485_vm5 = vcmp.ge.f32.partialorder %v484_v38, 1.0  ;;  %1177 = vmatprep.mubr.msk.f32.mxu0 %vm83_vm1, %v567_v39 }
 0x206   :  { %v1028_v41 = vsel %vm485_vm5, 1.0, %v1325_v1  ;;  %v489_v42 = vsel %vm485_vm5, 0.0, %v484_v38 }
 0x207   :  { %488 = vst.msk [vmem:[#allocation3 + $0x10] sm:$0xff] %vm83_vm1, %v1028_v41  ;;  %v1153_v43 = vpop.f32.mrb[4].mxu1  ;;  %v490_v44 = vadd.f32 %v489_v42, %v409_v40 }
 0x208   :  { %v413_v45 = vpop.f32.mrb[5].mxu1  ;;  %v568_v46 = vld [vmem:[#allocation3 + $0x8] sm:$0xff]  ;;  %v419_v51 = vadd.f32 %v1153_v43, %v1511_v25 }
 0x209   :  { %v414_v47 = vadd.f32 %v1511_v25, %v413_v45  ;;  %vm491_vm6 = vcmp.ge.f32.partialorder %v490_v44, 1.0  ;;  %1178 = vmatmul.mubr.msk.f32.vlgmr.msra.gmra.mrb[2].mxu0 %vm83_vm1, %v568_v46 }
 0x20a   :  { %v1029_v48 = vsel %vm491_vm6, 1.0, %v1325_v1  ;;  %v495_v49 = vsel %vm491_vm6, 0.0, %v490_v44 }
 0x20b   :  { %494 = vst.msk [vmem:[#allocation3 + $0x18] sm:$0xff] %vm83_vm1, %v1029_v48  ;;  %v496_v50 = vadd.f32 %v495_v49, %v414_v47 }
 0x20d   :  { %vm497_vm7 = vcmp.ge.f32.partialorder %v496_v50, 1.0 }
 0x20e   :  { %v1030_v52 = vsel %vm497_vm7, 1.0, %v1325_v1  ;;  %v501_v53 = vsel %vm497_vm7, 0.0, %v496_v50  ;;  %v569_v54 = vld [vmem:[#allocation3 + $0x10] sm:$0xff] }
 0x20f   :  { %500 = vst.msk [vmem:[#allocation3 + $0x20] sm:$0xff] %vm83_vm1, %v1030_v52  ;;  %v1156_v55 = vpop.f32.mrb[6].mxu1  ;;  %1180 = vmatprep.mubr.msk.f32.mxu0 %vm83_vm1, %v569_v54  ;;  %v502_v56 = vadd.f32 %v501_v53, %v419_v51 }
 0x210   :  { %v423_v57 = vpop.f32.mrb[7].mxu1  ;;  %v429_v63 = vadd.f32 %v1156_v55, %v1511_v25 }
 0x211   :  { %v424_v58 = vadd.f32 %v1511_v25, %v423_v57  ;;  %vm503_vm8 = vcmp.ge.f32.partialorder %v502_v56, 1.0 }
 0x212   :  { %v1031_v59 = vsel %vm503_vm8, 1.0, %v1325_v1  ;;  %v507_v60 = vsel %vm503_vm8, 0.0, %v502_v56  ;;  %v570_v61 = vld [vmem:[#allocation3 + $0x18] sm:$0xff] }
 0x213   :  { %506 = vst.msk [vmem:[#allocation3 + $0x28] sm:$0xff] %vm83_vm1, %v1031_v59  ;;  %v508_v62 = vadd.f32 %v507_v60, %v424_v58  ;;  %1181 = vmatmul.mubr.msk.f32.gmra.mrb[4].mxu0 %vm83_vm1, %v570_v61  ;;  %v898_v58 = vld [vmem:[%s1641_s7] sm:$0xff]  ;;  %v899_v59 = vld [vmem:[%s1641_s7 + $0x8] sm:$0xff]  ;;  %v900_v61 = vld [vmem:[%s1641_s7 + $0x10] sm:$0xff] }
 0x214   :  { %v1235_v60 = vpack.c.bf16 %v899_v59, %v898_v58 }
 0x215   :  { %vm509_vm9 = vcmp.ge.f32.partialorder %v508_v62, 1.0 }
 0x216   :  { %v1032_v2 = vsel %vm509_vm9, 1.0, %v1325_v1  ;;  %v513_v3 = vsel %vm509_vm9, 0.0, %v508_v62  ;;  %v571_v4 = vld [vmem:[#allocation3 + $0x20] sm:$0xff]  ;;  %1236 = vmatpush3.bf16.msra.mxu1 %v1235_v60  ;;  %v901_v62 = vld [vmem:[%s1641_s7 + $0x18] sm:$0xff] }
 0x217   :  { %512 = vst.msk [vmem:[#allocation3 + $0x30] sm:$0xff] %vm83_vm1, %v1032_v2  ;;  %v1159_v5 = vpop.f32.mrb[8].mxu1  ;;  %1183 = vmatprep.mubr.msk.f32.mxu0 %vm83_vm1, %v571_v4  ;;  %v514_v6 = vadd.f32 %v513_v3, %v429_v63  ;;  %1237 = vmatprep.subr.bf16.mxu1 %v1323_v0  ;;  %v1238_v63 = vpack.c.bf16 %v901_v62, %v900_v61  ;;  %v1593_v2 = vld [vmem:[%s1640_s6] ss:$0 sm:$0xff] }
 0x218   :  { %v433_v7 = vpop.f32.mrb[9].mxu1  ;;  %v439_v13 = vadd.f32 %v1159_v5, %v1511_v25 }
 0x219   :  { %v434_v8 = vadd.f32 %v1511_v25, %v433_v7  ;;  %vm515_vm10 = vcmp.ge.f32.partialorder %v514_v6, 1.0 }
 0x21a   :  { %v1033_v9 = vsel %vm515_vm10, 1.0, %v1325_v1  ;;  %v519_v10 = vsel %vm515_vm10, 0.0, %v514_v6  ;;  %v572_v11 = vld [vmem:[#allocation3 + $0x28] sm:$0xff]  ;;  %1239 = vmatpush3.bf16.msra.mxu1 %v1238_v63 }
 0x21b   :  { %518 = vst.msk [vmem:[#allocation3 + $0x38] sm:$0xff] %vm83_vm1, %v1033_v9  ;;  %v520_v12 = vadd.f32 %v519_v10, %v434_v8  ;;  %1184 = vmatmul.mubr.msk.f32.gmra.mrb[6].mxu0 %vm83_vm1, %v572_v11 }
 0x21d   :  { %vm521_vm11 = vcmp.ge.f32.partialorder %v520_v12, 1.0 }
 0x21e   :  { %v1034_v14 = vsel %vm521_vm11, 1.0, %v1325_v1  ;;  %v525_v15 = vsel %vm521_vm11, 0.0, %v520_v12  ;;  %v573_v16 = vld [vmem:[#allocation3 + $0x30] sm:$0xff] }
 0x21f   :  { %524 = vst.msk [vmem:[#allocation3 + $0x40] sm:$0xff] %vm83_vm1, %v1034_v14  ;;  %v1162_v18 = vpop.f32.mrb[10].mxu1  ;;  %1186 = vmatprep.mubr.msk.f32.mxu0 %vm83_vm1, %v573_v16  ;;  %v526_v19 = vadd.f32 %v525_v15, %v439_v13 }
 0x220   :  { %v443_v20 = vpop.f32.mrb[11].mxu1  ;;  %v449_v26 = vadd.f32 %v1162_v18, %v1511_v25 }
 0x221   :  { %v444_v21 = vadd.f32 %v1511_v25, %v443_v20  ;;  %vm527_vm12 = vcmp.ge.f32.partialorder %v526_v19, 1.0 }
 0x222   :  { %v1035_v17 = vsel %vm527_vm12, 1.0, %v1325_v1  ;;  %v531_v22 = vsel %vm527_vm12, 0.0, %v526_v19  ;;  %v574_v23 = vld [vmem:[#allocation3 + $0x38] sm:$0xff] }
 0x223   :  { %530 = vst.msk [vmem:[#allocation3 + $0x48] sm:$0xff] %vm83_vm1, %v1035_v17  ;;  %v532_v24 = vadd.f32 %v531_v22, %v444_v21  ;;  %1187 = vmatmul.mubr.msk.f32.gmra.mrb[8].mxu0 %vm83_vm1, %v574_v23 }
 0x225   :  { %vm533_vm13 = vcmp.ge.f32.partialorder %v532_v24, 1.0 }
 0x226   :  { %v1036_v27 = vsel %vm533_vm13, 1.0, %v1325_v1  ;;  %v537_v28 = vsel %vm533_vm13, 0.0, %v532_v24  ;;  %v575_v29 = vld [vmem:[#allocation3 + $0x40] sm:$0xff] }
 0x227   :  { %536 = vst.msk [vmem:[#allocation3 + $0x50] sm:$0xff] %vm83_vm1, %v1036_v27  ;;  %v1165_v30 = vpop.f32.mrb[12].mxu1  ;;  %1189 = vmatprep.mubr.msk.f32.mxu0 %vm83_vm1, %v575_v29  ;;  %v538_v31 = vadd.f32 %v537_v28, %v449_v26 }
 0x228   :  { %v453_v32 = vpop.f32.mrb[13].mxu1  ;;  %v459_v38 = vadd.f32 %v1165_v30, %v1511_v25 }
 0x229   :  { %v454_v33 = vadd.f32 %v1511_v25, %v453_v32  ;;  %vm539_vm14 = vcmp.ge.f32.partialorder %v538_v31, 1.0 }
 0x22a   :  { %v1037_v34 = vsel %vm539_vm14, 1.0, %v1325_v1  ;;  %v543_v35 = vsel %vm539_vm14, 0.0, %v538_v31  ;;  %v576_v36 = vld [vmem:[#allocation3 + $0x48] sm:$0xff] }
 0x22b   :  { %542 = vst.msk [vmem:[#allocation3 + $0x58] sm:$0xff] %vm83_vm1, %v1037_v34  ;;  %v544_v37 = vadd.f32 %v543_v35, %v454_v33  ;;  %1190 = vmatmul.mubr.msk.f32.gmra.mrb[10].mxu0 %vm83_vm1, %v576_v36 }
 0x22d   :  { %vm545_vm15 = vcmp.ge.f32.partialorder %v544_v37, 1.0 }
 0x22e   :  { %v1038_v39 = vsel %vm545_vm15, 1.0, %v1325_v1  ;;  %v549_v40 = vsel %vm545_vm15, 0.0, %v544_v37  ;;  %v577_v41 = vld [vmem:[#allocation3 + $0x50] sm:$0xff] }
 0x22f   :  { %548 = vst.msk [vmem:[#allocation3 + $0x60] sm:$0xff] %vm83_vm1, %v1038_v39  ;;  %v1168_v42 = vpop.f32.mrb[14].mxu1  ;;  %1192 = vmatprep.mubr.msk.f32.mxu0 %vm83_vm1, %v577_v41  ;;  %v550_v43 = vadd.f32 %v549_v40, %v459_v38 }
 0x230   :  { %v463_v44 = vpop.f32.mrb[15].mxu1  ;;  %v469_v50 = vadd.f32 %v1168_v42, %v1511_v25 }
 0x231   :  { %v464_v45 = vadd.f32 %v1511_v25, %v463_v44  ;;  %vm551_vm2 = vcmp.ge.f32.partialorder %v550_v43, 1.0 }
 0x232   :  { %v1039_v46 = vsel %vm551_vm2, 1.0, %v1325_v1  ;;  %v555_v47 = vsel %vm551_vm2, 0.0, %v550_v43  ;;  %v578_v48 = vld [vmem:[#allocation3 + $0x58] sm:$0xff] }
 0x233   :  { %554 = vst.msk [vmem:[#allocation3 + $0x68] sm:$0xff] %vm83_vm1, %v1039_v46  ;;  %v556_v49 = vadd.f32 %v555_v47, %v464_v45  ;;  %1193 = vmatmul.mubr.msk.f32.gmra.mrb[12].mxu0 %vm83_vm1, %v578_v48 }
 0x235   :  { %vm557_vm3 = vcmp.ge.f32.partialorder %v556_v49, 1.0 }
 0x236   :  { %v1040_v51 = vsel %vm557_vm3, 1.0, %v1325_v1  ;;  %v561_v52 = vsel %vm557_vm3, 0.0, %v556_v49  ;;  %v579_v53 = vld [vmem:[#allocation3 + $0x60] sm:$0xff] }
 0x237   :  { %560 = vst.msk [vmem:[#allocation3 + $0x70] sm:$0xff] %vm83_vm1, %v1040_v51  ;;  %v562_v54 = vadd.f32 %v561_v52, %v469_v50  ;;  %1195 = vmatprep.mubr.msk.f32.mxu0 %vm83_vm1, %v579_v53 }
 0x239   :  { %vm563_vm0 = vcmp.ge.f32.partialorder %v562_v54, 1.0 }
 0x23a   :  { %v1041_v55 = vsel %vm563_vm0, 1.0, %v1325_v1  ;;  %v580_v56 = vld [vmem:[#allocation3 + $0x68] sm:$0xff] }
 0x23b   :  { %566 = vst.msk [vmem:[#allocation3 + $0x78] sm:$0xff] %vm83_vm1, %v1041_v55  ;;  %1196 = vmatmul.mubr.msk.f32.gmra.mrb[14].mxu0 %vm83_vm1, %v580_v56 }
 0x23e   :  { %v581_v57 = vld [vmem:[#allocation3 + $0x70] sm:$0xff] }
 0x23f   :  { %1198 = vmatprep.mubr.msk.f32.mxu0 %vm83_vm1, %v581_v57 }
 0x242   :  { %v582_v25 = vld [vmem:[#allocation3 + $0x78] sm:$0xff] }
 0x243   :  { %1199 = vmatmul.mubr.msk.f32.gmra.mrb[16].mxu0 %vm83_vm1, %v582_v25 }
 0x2dc   :  { %v1179_v3 = vpop.f32.mrb[2].mxu0 }
 0x2dd   :  { %v708_v4 = vpop.f32.mrb[3].mxu0  ;;  %v714_v0 = vadd.f32 %v1179_v3, %v1593_v2 }
 0x2de   :  { %v709_v5 = vadd.f32 %v1593_v2, %v708_v4 }
 0x2e0   :  { %vm788_vm4 = vcmp.ge.f32.partialorder %v709_v5, 1.0 }
 0x2e1   :  { %v793_v6 = vsel %vm788_vm4, 0.0, %v709_v5  ;;  %v1059_v8 = vsel %vm788_vm4, 1.0, %v1325_v1 }
 0x2e2   :  { %v794_v7 = vadd.f32 %v793_v6, %v714_v0  ;;  %v791_v10 = vmul.f32 1.5258789e-05, %v1059_v8 }
 0x2e4   :  { %vm795_vm5 = vcmp.ge.f32.partialorder %v794_v7, 1.0 }
 0x2e5   :  { %v1060_v9 = vsel %vm795_vm5, 1.0, %v1325_v1  ;;  %v800_v16 = vsel %vm795_vm5, 0.0, %v794_v7  ;;  %vm983_vm5 = vcmask 31744  }
 0x2e6   :  { %v1182_v11 = vpop.f32.mrb[4].mxu0  ;;  %v798_v12 = vmul.f32 3.0517578e-05, %v1060_v9 }
 0x2e7   :  { %v718_v13 = vpop.f32.mrb[5].mxu0  ;;  %v724_v19 = vadd.f32 %v1182_v11, %v1593_v2 }
 0x2e8   :  { %v719_v14 = vadd.f32 %v1593_v2, %v718_v13  ;;  %v799_v15 = vadd.f32 %v798_v12, %v791_v10 }
 0x2ea   :  { %v801_v18 = vadd.f32 %v800_v16, %v719_v14 }
 0x2ec   :  { %vm802_vm6 = vcmp.ge.f32.partialorder %v801_v18, 1.0 }
 0x2ed   :  { %v1061_v20 = vsel %vm802_vm6, 1.0, %v1325_v1  ;;  %v807_v21 = vsel %vm802_vm6, 0.0, %v801_v18 }
 0x2ee   :  { %v805_v17 = vmul.f32 6.1035156e-05, %v1061_v20  ;;  %v1185_v22 = vpop.f32.mrb[6].mxu0  ;;  %v808_v23 = vadd.f32 %v807_v21, %v724_v19 }
 0x2ef   :  { %v728_v24 = vpop.f32.mrb[7].mxu0  ;;  %v734_v32 = vadd.f32 %v1185_v22, %v1593_v2 }
 0x2f0   :  { %v806_v26 = vadd.f32 %v805_v17, %v799_v15  ;;  %v729_v27 = vadd.f32 %v1593_v2, %v728_v24  ;;  %vm809_vm7 = vcmp.ge.f32.partialorder %v808_v23, 1.0 }
 0x2f1   :  { %v1062_v28 = vsel %vm809_vm7, 1.0, %v1325_v1  ;;  %v814_v29 = vsel %vm809_vm7, 0.0, %v808_v23 }
 0x2f2   :  { %v812_v30 = vmul.f32 0.00012207031, %v1062_v28  ;;  %v815_v31 = vadd.f32 %v814_v29, %v729_v27 }
 0x2f4   :  { %v813_v33 = vadd.f32 %v812_v30, %v806_v26  ;;  %vm816_vm8 = vcmp.ge.f32.partialorder %v815_v31, 1.0 }
 0x2f5   :  { %v1063_v34 = vsel %vm816_vm8, 1.0, %v1325_v1  ;;  %v821_v35 = vsel %vm816_vm8, 0.0, %v815_v31 }
 0x2f6   :  { %v819_v36 = vmul.f32 0.00024414063, %v1063_v34  ;;  %v1188_v37 = vpop.f32.mrb[8].mxu0  ;;  %v822_v38 = vadd.f32 %v821_v35, %v734_v32 }
 0x2f7   :  { %v738_v39 = vpop.f32.mrb[9].mxu0  ;;  %v744_v46 = vadd.f32 %v1188_v37, %v1593_v2 }
 0x2f8   :  { %v820_v40 = vadd.f32 %v819_v36, %v813_v33  ;;  %v739_v41 = vadd.f32 %v1593_v2, %v738_v39  ;;  %vm823_vm9 = vcmp.ge.f32.partialorder %v822_v38, 1.0 }
 0x2f9   :  { %v1064_v42 = vsel %vm823_vm9, 1.0, %v1325_v1  ;;  %v828_v43 = vsel %vm823_vm9, 0.0, %v822_v38 }
 0x2fa   :  { %v826_v44 = vmul.f32 0.00048828125, %v1064_v42  ;;  %v829_v45 = vadd.f32 %v828_v43, %v739_v41 }
 0x2fc   :  { %v827_v47 = vadd.f32 %v826_v44, %v820_v40  ;;  %vm830_vm10 = vcmp.ge.f32.partialorder %v829_v45, 1.0 }
 0x2fd   :  { %v1065_v48 = vsel %vm830_vm10, 1.0, %v1325_v1  ;;  %v835_v49 = vsel %vm830_vm10, 0.0, %v829_v45 }
 0x2fe   :  { %v833_v50 = vmul.f32 0.0009765625, %v1065_v48  ;;  %v1191_v51 = vpop.f32.mrb[10].mxu0  ;;  %v836_v52 = vadd.f32 %v835_v49, %v744_v46 }
 0x2ff   :  { %v748_v53 = vpop.f32.mrb[11].mxu0  ;;  %v754_v59 = vadd.f32 %v1191_v51, %v1593_v2 }
 0x300   :  { %v834_v54 = vadd.f32 %v833_v50, %v827_v47  ;;  %v749_v55 = vadd.f32 %v1593_v2, %v748_v53  ;;  %vm837_vm11 = vcmp.ge.f32.partialorder %v836_v52, 1.0  ;;  %v905_v50 = vlaneseq }
 0x301   :  { %v1066_v56 = vsel %vm837_vm11, 1.0, %v1325_v1  ;;  %v842_v57 = vsel %vm837_vm11, 0.0, %v836_v52 }
 0x302   :  { %v840_v25 = vmul.f32 0.001953125, %v1066_v56  ;;  %v843_v58 = vadd.f32 %v842_v57, %v749_v55  ;;  %v906_v51 = vshrl.u32 %v905_v50, 7 }
 0x304   :  { %v841_v60 = vadd.f32 %v840_v25, %v834_v54  ;;  %vm844_vm12 = vcmp.ge.f32.partialorder %v843_v58, 1.0  ;;  %v907_v53 = vsub.s32 0, %v906_v51 }
 0x305   :  { %v1067_v61 = vsel %vm844_vm12, 1.0, %v1325_v1  ;;  %v849_v62 = vsel %vm844_vm12, 0.0, %v843_v58 }
 0x306   :  { %v847_v63 = vmul.f32 0.00390625, %v1067_v61  ;;  %v1194_v3 = vpop.f32.mrb[12].mxu0  ;;  %v850_v4 = vadd.f32 %v849_v62, %v754_v59 }
 0x307   :  { %v758_v5 = vpop.f32.mrb[13].mxu0  ;;  %v764_v11 = vadd.f32 %v1194_v3, %v1593_v2 }
 0x308   :  { %v848_v0 = vadd.f32 %v847_v63, %v841_v60  ;;  %v759_v6 = vadd.f32 %v1593_v2, %v758_v5  ;;  %vm851_vm13 = vcmp.ge.f32.partialorder %v850_v4, 1.0 }
 0x309   :  { %v1068_v7 = vsel %vm851_vm13, 1.0, %v1325_v1  ;;  %v856_v8 = vsel %vm851_vm13, 0.0, %v850_v4 }
 0x30a   :  { %v854_v9 = vmul.f32 0.0078125, %v1068_v7  ;;  %v857_v10 = vadd.f32 %v856_v8, %v759_v6 }
 0x30c   :  { %v855_v12 = vadd.f32 %v854_v9, %v848_v0  ;;  %vm858_vm14 = vcmp.ge.f32.partialorder %v857_v10, 1.0 }
 0x30d   :  { %v1069_v13 = vsel %vm858_vm14, 1.0, %v1325_v1  ;;  %v863_v14 = vsel %vm858_vm14, 0.0, %v857_v10 }
 0x30e   :  { %v861_v15 = vmul.f32 0.015625, %v1069_v13  ;;  %v1197_v16 = vpop.f32.mrb[14].mxu0  ;;  %v864_v18 = vadd.f32 %v863_v14, %v764_v11 }
 0x30f   :  { %v768_v19 = vpop.f32.mrb[15].mxu0  ;;  %v774_v26 = vadd.f32 %v1197_v16, %v1593_v2 }
 0x310   :  { %v862_v20 = vadd.f32 %v861_v15, %v855_v12  ;;  %v769_v21 = vadd.f32 %v1593_v2, %v768_v19  ;;  %vm865_vm15 = vcmp.ge.f32.partialorder %v864_v18, 1.0 }
 0x311   :  { %v1070_v17 = vsel %vm865_vm15, 1.0, %v1325_v1  ;;  %v870_v22 = vsel %vm865_vm15, 0.0, %v864_v18 }
 0x312   :  { %v868_v23 = vmul.f32 0.03125, %v1070_v17  ;;  %v871_v24 = vadd.f32 %v870_v22, %v769_v21 }
 0x314   :  { %v869_v27 = vadd.f32 %v868_v23, %v862_v20  ;;  %vm872_vm2 = vcmp.ge.f32.partialorder %v871_v24, 1.0 }
 0x315   :  { %v1071_v28 = vsel %vm872_vm2, 1.0, %v1325_v1  ;;  %v877_v29 = vsel %vm872_vm2, 0.0, %v871_v24 }
 0x316   :  { %v875_v30 = vmul.f32 0.0625, %v1071_v28  ;;  %v1200_v31 = vpop.f32.mrb[16].mxu0  ;;  %v878_v32 = vadd.f32 %v877_v29, %v774_v26 }
 0x317   :  { %v778_v33 = vpop.f32.mrb[17].mxu0  ;;  %v784_v40 = vadd.f32 %v1200_v31, %v1593_v2 }
 0x318   :  { %v876_v34 = vadd.f32 %v875_v30, %v869_v27  ;;  %v779_v35 = vadd.f32 %v1593_v2, %v778_v33  ;;  %vm879_vm3 = vcmp.ge.f32.partialorder %v878_v32, 1.0  ;;  %v902_v2 = vld [vmem:[%s1642_s8] sm:$0x1] }
 0x319   :  { %v1072_v36 = vsel %vm879_vm3, 1.0, %v1325_v1  ;;  %v884_v37 = vsel %vm879_vm3, 0.0, %v878_v32  ;;  %v903_v52 = vmul.f32 0.99998474, %v902_v2 }
 0x31a   :  { %v882_v38 = vmul.f32 0.125, %v1072_v36  ;;  %v885_v39 = vadd.f32 %v884_v37, %v779_v35 }
 0x31b   :  { %v908_v54 = vrot.slane %v903_v52, %v907_v53 }
 0x31c   :  { %v883_v41 = vadd.f32 %v882_v38, %v876_v34  ;;  %vm886_vm0 = vcmp.ge.f32.partialorder %v885_v39, 1.0 }
 0x31d   :  { %v1073_v42 = vsel %vm886_vm0, 1.0, %v1325_v1  ;;  %v891_v43 = vsel %vm886_vm0, 0.0, %v885_v39 }
 0x31e   :  { %v889_v44 = vmul.f32 0.25, %v1073_v42  ;;  %v892_v45 = vadd.f32 %v891_v43, %v784_v40 }
 0x320   :  { %v890_v46 = vadd.f32 %v889_v44, %v883_v41  ;;  %vm893_vm4 = vcmp.ge.f32.partialorder %v892_v45, 1.0 }
 0x321   :  { %v1074_v47 = vsel %vm893_vm4, 1.0, %v1325_v1 }
 0x322   :  { %v896_v48 = vmul.f32 0.5, %v1074_v47 }
 0x324   :  { %v897_v49 = vadd.f32 %v896_v48, %v890_v46 }
 0x326   :  { %1210 = vmatmul.mubr.msk.f32.vlgmr.msra.gmra.mrb[16].mxu1 %vm83_vm1, %v897_v49 }
 0x3f9   :  { %v979_v55 = vpop.f32.mrb[16].mxu1 }
 0x3fa   :  { %v980_v56 = vadd.f32 %v979_v55, %v908_v54  ;;  %v1211_v57 = vpop.f32.mrb[17].mxu1 }
 0x3fc   :  { %984 = vst.msk [vmem:[%s1643_s9] sm:$0xff] %vm983_vm5, %v980_v56 }
 0x3fd   :  { %989 = vsyncpa [#allocation5], 1 }
 0x3fe   :  { %990 = vsyncpa [#allocation7], 1 }

</bundles_post_ra>
